<compile_context>
chip_gen: v7x
topology: tpu7x:2x2x1
jax: 0.10.0
libtpu: 0.0.40
codegen_flags: <defaults>
</compile_context>

<pallas_src>
import functools

import jax
import jax.numpy as jnp
from jax.experimental import pallas as pl
from jax.experimental.pallas import tpu as pltpu


# --------------------------------------------------------------------------- #
# helpers
# --------------------------------------------------------------------------- #
_LN_EPS = 1e-5
_SQRT2 = 1.4142135623730951
_MASK = -1e30  # large negative finite (avoids inf-inf NaN in the online softmax)


def _tile(n, candidates=(512, 256, 128, 64, 32, 16, 8)):
    """Largest tile from `candidates` dividing n (prefers 512/256 per review)."""
    for c in candidates:
        if n % c == 0:
            return c
    return n


def _vmem_limit_bytes(*sizes):
    # x2 for double buffering + 4 MiB headroom; never below the default scoped
    # limit, capped below physical VMEM (re-check vs 64 MiB when targeting v7x).
    total = 2 * sum(int(s) for s in sizes) + (4 << 20)
    return int(min(max(total, 32 << 20), 100 << 20))


def _layernorm(x, gamma, beta):
    mu = jnp.mean(x, axis=-1, keepdims=True)
    var = jnp.mean((x - mu) ** 2, axis=-1, keepdims=True)
    return (x - mu) * jax.lax.rsqrt(var + _LN_EPS) * gamma + beta


def _erf(x):
    # Abramowitz & Stegun 7.1.26 polynomial (|err| <= 1.5e-7); only exp/mul/add.
    a1, a2, a3, a4, a5 = (0.254829592, -0.284496736, 1.421413741,
                          -1.453152027, 1.061405429)
    p = 0.3275911
    ax = jnp.abs(x)
    t = 1.0 / (1.0 + p * ax)
    poly = ((((a5 * t + a4) * t + a3) * t + a2) * t + a1) * t
    y = 1.0 - poly * jnp.exp(-ax * ax)
    return jnp.where(x >= 0, y, -y)


def _gelu_exact(x):
    # matches torch.nn.GELU() (erf form) to ~1.5e-7
    return 0.5 * x * (1.0 + _erf(x * (1.0 / _SQRT2)))


# --------------------------------------------------------------------------- #
# kernels
# --------------------------------------------------------------------------- #
def input_proj_kernel(x_ref, w_ref, b_ref, pos_ref, o_ref, *, d_input):
    # x_ref: (1, tt, d_input) f32; pos_ref: (tt, D) f32. K = d_input is tiny (3)
    # -> VPU multiply-add instead of a pathological K=3 MXU matmul.
    x = x_ref[0].astype(jnp.float32)
    acc = pos_ref[...] + b_ref[...]
    for i in range(d_input):                       # static, tiny unrolled loop
        acc = acc + x[:, i:i + 1] * w_ref[i:i + 1, :]
    o_ref[0] = acc.astype(o_ref.dtype)


def ln_qkv_kernel(x_ref, g_ref, be_ref, wq_ref, wk_ref, wv_ref,
                  bq_ref, bk_ref, bv_ref, q_ref, k_ref, v_ref, *, n_heads):
    # x_ref: (rt, D) f32 residual rows; weights head-major (n_heads, D, hd).
    # q/k/v are written head-major (n_heads, rt, hd) -> no XLA transposes later.
    xn = _layernorm(x_ref[...], g_ref[...], be_ref[...])     # f32 LN (once per tile)
    xb = xn.astype(jnp.bfloat16)                              # bf16 MXU operands
    for h in range(n_heads):                                  # static unrolled
        q = jnp.dot(xb, wq_ref[h], preferred_element_type=jnp.float32) + bq_ref[h]
        k = jnp.dot(xb, wk_ref[h], preferred_element_type=jnp.float32) + bk_ref[h]
        v = jnp.dot(xb, wv_ref[h], preferred_element_type=jnp.float32) + bv_ref[h]
        q_ref[h] = q.astype(q_ref.dtype)
        k_ref[h] = k.astype(k_ref.dtype)
        v_ref[h] = v.astype(v_ref.dtype)


def flash_attn_kernel(q_ref, k_ref, v_ref, o_ref, m_sc, l_sc, acc_sc,
                      *, scale, tq, tk):
    # grid = (n_heads, B, nq, nk); kv axis (3) is the "arbitrary" reduction axis.
    qi = pl.program_id(2)
    ki = pl.program_id(3)

    @pl.when(ki == 0)
    def _():
        m_sc[...] = jnp.full_like(m_sc, _MASK)
        l_sc[...] = jnp.zeros_like(l_sc)
        acc_sc[...] = jnp.zeros_like(acc_sc)

    # Skip kv tiles strictly above the causal diagonal.
    @pl.when(ki * tk <= qi * tq + (tq - 1))
    def _():
        q = q_ref[0]                                          # (tq, hd) bf16
        k = k_ref[0]                                          # (tk, hd) bf16
        v = v_ref[0]                                          # (tk, hd) bf16
        s = jax.lax.dot_general(q, k, (((1,), (1,)), ((), ())),
                                preferred_element_type=jnp.float32) * scale
        row = qi * tq + jax.lax.broadcasted_iota(jnp.int32, (tq, tk), 0)
        col = ki * tk + jax.lax.broadcasted_iota(jnp.int32, (tq, tk), 1)
        s = jnp.where(col <= row, s, _MASK)                   # tile-local causal mask
        m_prev = m_sc[...]
        m_new = jnp.maximum(m_prev, s.max(axis=-1, keepdims=True))
        alpha = jnp.exp(m_prev - m_new)
        p = jnp.exp(s - m_new)
        l_sc[...] = alpha * l_sc[...] + p.sum(axis=-1, keepdims=True)
        acc_sc[...] = alpha * acc_sc[...] + jnp.dot(
            p.astype(v.dtype), v, preferred_element_type=jnp.float32)
        m_sc[...] = m_new

    @pl.when(ki == pl.num_programs(3) - 1)
    def _():
        inv_l = pl.reciprocal(l_sc[...], approx=True)         # EUP, off the VALU
        o_ref[0] = (acc_sc[...] * inv_l).astype(o_ref.dtype)


def post_attn_mlp_kernel(x_ref, a_ref, wpo_ref, bpo_ref, g2_ref, be2_ref,
                         w1_ref, b1_ref, w2_ref, b2_ref, o_ref, *, n_heads):
    # x_ref: (rt, D) f32 residual; a_ref: (n_heads, rt, hd) bf16 head-major attn out.
    # wpo = head-major rows of (wproj @ wsc) -> head merge + projection folded in.
    proj = jnp.dot(a_ref[0], wpo_ref[0], preferred_element_type=jnp.float32)
    for h in range(1, n_heads):                               # static unrolled
        proj = proj + jnp.dot(a_ref[h], wpo_ref[h],
                              preferred_element_type=jnp.float32)
    x = x_ref[...] + proj + bpo_ref[...]                      # residual 1
    xn = _layernorm(x, g2_ref[...], be2_ref[...])
    h1 = jnp.dot(xn.astype(jnp.bfloat16), w1_ref[...],
                 preferred_element_type=jnp.float32) + b1_ref[...]
    h1 = _gelu_exact(h1)                                      # f32 GELU (exact, erf)
    mlp = jnp.dot(h1.astype(jnp.bfloat16), w2_ref[...],
                  preferred_element_type=jnp.float32) + b2_ref[...]
    o_ref[...] = (x + mlp).astype(o_ref.dtype)                # residual 2


def head_kernel(x_ref, g_ref, be_ref, w_ref, bo_ref, o_ref):
    # ln_f + output projection on the last time step only.
    x = x_ref[...].astype(jnp.float32)
    xn = _layernorm(x, g_ref[...], be_ref[...])
    o_ref[...] = (jnp.dot(xn.astype(jnp.bfloat16), w_ref[...],
                          preferred_element_type=jnp.float32)
                  + bo_ref[...]).astype(o_ref.dtype)


# --------------------------------------------------------------------------- #
# pallas_call wrappers
# --------------------------------------------------------------------------- #
def input_projection(x, w_in, b_in, pos_t):
    B, T, Din = x.shape
    D = w_in.shape[1]
    tt = _tile(T)
    nt = T // tt
    kernel = functools.partial(input_proj_kernel, d_input=Din)
    vmem = _vmem_limit_bytes(tt * Din * 4, Din * D * 4, D * 4,
                             tt * D * 4, tt * D * 4)
    return pl.pallas_call(
        kernel,
        out_shape=jax.ShapeDtypeStruct((B, T, D), jnp.float32),
        grid=(nt, B),                       # b inner: pos block stays resident
        in_specs=[
            pl.BlockSpec((1, tt, Din), lambda t, b: (b, t, 0)),
            pl.BlockSpec((Din, D), lambda t, b: (0, 0)),
            pl.BlockSpec((1, D), lambda t, b: (0, 0)),
            pl.BlockSpec((tt, D), lambda t, b: (t, 0)),
        ],
        out_specs=pl.BlockSpec((1, tt, D), lambda t, b: (b, t, 0)),
        compiler_params=pltpu.CompilerParams(
            dimension_semantics=("parallel", "parallel"),
            vmem_limit_bytes=vmem),
    )(x, w_in, b_in, pos_t)


def ln_qkv(x_rows, p, n_heads):
    R, D = x_rows.shape
    hd = D // n_heads
    rt = _tile(R)
    row_in = pl.BlockSpec((rt, D), lambda r: (r, 0))
    head_out = pl.BlockSpec((n_heads, rt, hd), lambda r: (0, r, 0))
    w_spec = pl.BlockSpec((n_heads, D, hd), lambda r: (0, 0, 0))
    b_spec = pl.BlockSpec((n_heads, 1, hd), lambda r: (0, 0, 0))
    vec_spec = pl.BlockSpec((1, D), lambda r: (0, 0))
    out = jax.ShapeDtypeStruct((n_heads, R, hd), jnp.bfloat16)
    kernel = functools.partial(ln_qkv_kernel, n_heads=n_heads)
    vmem = _vmem_limit_bytes(rt * D * 4, 2 * D * 4, 3 * D * D * 2,
                             3 * D * 4, 3 * rt * D * 2)
    return pl.pallas_call(
        kernel,
        out_shape=(out, out, out),
        grid=(R // rt,),
        in_specs=[row_in, vec_spec, vec_spec, w_spec, w_spec, w_spec,
                  b_spec, b_spec, b_spec],
        out_specs=(head_out, head_out, head_out),
        compiler_params=pltpu.CompilerParams(
            dimension_semantics=("parallel",),
            vmem_limit_bytes=vmem),
    )(x_rows, p["ln1_g"], p["ln1_b"], p["wq"], p["wk"], p["wv"],
      p["bq"], p["bk"], p["bv"])


def attention(q, k, v, B, T, n_heads):
    # q/k/v: (n_heads, B*T, hd) bf16, head-major; read with computed block indices
    # so no reshape/transpose is needed between ln_qkv and this call.
    H, R, hd = q.shape
    tq = _tile(T, (256, 128, 64, 32, 16, 8))
    tk = _tile(T, (512, 256, 128, 64, 32, 16, 8))
    nq, nk = T // tq, T // tk
    scale = 1.0 / float(hd) ** 0.5
    kernel = functools.partial(flash_attn_kernel, scale=scale, tq=tq, tk=tk)
    q_spec = pl.BlockSpec((1, tq, hd), lambda h, b, qi, ki: (h, b * nq + qi, 0))
    kv_spec = pl.BlockSpec((1, tk, hd), lambda h, b, qi, ki: (h, b * nk + ki, 0))
    o_spec = pl.BlockSpec((1, tq, hd), lambda h, b, qi, ki: (h, b * nq + qi, 0))
    vmem = _vmem_limit_bytes(tq * hd * 2, 2 * tk * hd * 2, tq * hd * 2,
                             tq * tk * 4, tq * hd * 4, tq * 8)
    return pl.pallas_call(
        kernel,
        out_shape=jax.ShapeDtypeStruct((H, R, hd), jnp.bfloat16),
        grid=(H, B, nq, nk),
        in_specs=[q_spec, kv_spec, kv_spec],
        out_specs=o_spec,
        scratch_shapes=[pltpu.VMEM((tq, 1), jnp.float32),
                        pltpu.VMEM((tq, 1), jnp.float32),
                        pltpu.VMEM((tq, hd), jnp.float32)],
        compiler_params=pltpu.CompilerParams(
            dimension_semantics=("parallel", "parallel", "parallel", "arbitrary"),
            vmem_limit_bytes=vmem),
    )(q, k, v)


def post_attn_mlp(x_rows, attn_heads, p, n_heads):
    R, D = x_rows.shape
    hd = D // n_heads
    F = p["w1"].shape[1]
    rt = _tile(R)
    row_spec = pl.BlockSpec((rt, D), lambda r: (r, 0))
    kernel = functools.partial(post_attn_mlp_kernel, n_heads=n_heads)
    vmem = _vmem_limit_bytes(rt * D * 4, rt * D * 2, D * D * 2, 3 * D * 4,
                             D * F * 2, F * 4, F * D * 2, D * 4,
                             rt * D * 4, rt * F * 4)
    return pl.pallas_call(
        kernel,
        out_shape=jax.ShapeDtypeStruct((R, D), jnp.float32),
        grid=(R // rt,),
        in_specs=[
            row_spec,
            pl.BlockSpec((n_heads, rt, hd), lambda r: (0, r, 0)),
            pl.BlockSpec((n_heads, hd, D), lambda r: (0, 0, 0)),
            pl.BlockSpec((1, D), lambda r: (0, 0)),
            pl.BlockSpec((1, D), lambda r: (0, 0)),
            pl.BlockSpec((1, D), lambda r: (0, 0)),
            pl.BlockSpec((D, F), lambda r: (0, 0)),
            pl.BlockSpec((1, F), lambda r: (0, 0)),
            pl.BlockSpec((F, D), lambda r: (0, 0)),
            pl.BlockSpec((1, D), lambda r: (0, 0)),
        ],
        out_specs=row_spec,
        compiler_params=pltpu.CompilerParams(
            dimension_semantics=("parallel",),
            vmem_limit_bytes=vmem),
    )(x_rows, attn_heads, p["w_po"], p["b_po"], p["ln2_g"], p["ln2_b"],
      p["w1"], p["b1"], p["w2"], p["b2"])


def final_head(x_last, g, b, w_out, b_out):
    B, D = x_last.shape
    n_out = w_out.shape[1]
    zero2 = lambda i: (0, 0)
    return pl.pallas_call(
        head_kernel,
        out_shape=jax.ShapeDtypeStruct((B, n_out), jnp.float32),
        grid=(1,),
        in_specs=[
            pl.BlockSpec((B, D), zero2),
            pl.BlockSpec((1, D), zero2),
            pl.BlockSpec((1, D), zero2),
            pl.BlockSpec((D, n_out), zero2),
            pl.BlockSpec((1, n_out), zero2),
        ],
        out_specs=pl.BlockSpec((B, n_out), zero2),
    )(x_last, g, b, w_out, b_out)


# --------------------------------------------------------------------------- #
# decoder block (three pallas_calls, no XLA transposes in between)
# --------------------------------------------------------------------------- #
def decoder_block(x_rows, p, B, T, n_heads):
    q, k, v = ln_qkv(x_rows, p, n_heads)            # each (n_heads, B*T, hd) bf16
    attn = attention(q, k, v, B, T, n_heads)        # (n_heads, B*T, hd) bf16
    return post_attn_mlp(x_rows, attn, p, n_heads)  # (B*T, D) f32


# --------------------------------------------------------------------------- #
# offline weight preparation (runs once, outside jit) + model assembly
# --------------------------------------------------------------------------- #
def create_layer_mapping(n_layers, n_blocks):
    mapping = [0]
    middle_start_idx = 1
    while len(mapping) < n_layers - 1:
        mapping.extend([middle_start_idx, middle_start_idx + 1])
        middle_start_idx += 1
    mapping = mapping[:n_layers - 1]
    mapping.append(n_blocks - 1)
    return mapping


def prepare_block(blk, d_model, n_heads):
    """Split QKV per head, fold proj@scale_combine (head-major), cast bf16."""
    D = d_model
    hd = D // n_heads
    wqkv, bqkv = blk["wqkv"], blk["bqkv"]
    w_po = blk["wproj"] @ blk["wsc"]                 # (D, D) proj -> scale_combine
    b_po = blk["bproj"] @ blk["wsc"] + blk["bsc"]    # (1, D)

    def head_cols(w):   # (D, D) -> (n_heads, D, hd): head h = cols [h*hd,(h+1)*hd)
        return jnp.transpose(w.reshape(D, n_heads, hd), (1, 0, 2))

    def head_bias(b):   # (1, D) -> (n_heads, 1, hd)
        return b.reshape(n_heads, 1, hd)

    return {
        "ln1_g": blk["ln1_g"], "ln1_b": blk["ln1_b"],
        "wq": head_cols(wqkv[:, 0 * D:1 * D]).astype(jnp.bfloat16),
        "wk": head_cols(wqkv[:, 1 * D:2 * D]).astype(jnp.bfloat16),
        "wv": head_cols(wqkv[:, 2 * D:3 * D]).astype(jnp.bfloat16),
        "bq": head_bias(bqkv[:, 0 * D:1 * D]),
        "bk": head_bias(bqkv[:, 1 * D:2 * D]),
        "bv": head_bias(bqkv[:, 2 * D:3 * D]),
        "w_po": w_po.reshape(n_heads, hd, D).astype(jnp.bfloat16),  # head-major rows
        "b_po": b_po,
        "ln2_g": blk["ln2_g"], "ln2_b": blk["ln2_b"],
        "w1": blk["w1"].astype(jnp.bfloat16), "b1": blk["b1"],
        "w2": blk["w2"].astype(jnp.bfloat16), "b2": blk["b2"],
    }


def prepare_params(params, n_heads):
    D = params["w_in"].shape[1]
    return {
        "w_in": params["w_in"], "b_in": params["b_in"], "pos": params["pos"],
        "ln_f_g": params["ln_f_g"], "ln_f_b": params["ln_f_b"],
        "w_out": params["w_out"].astype(jnp.bfloat16), "b_out": params["b_out"],
        "blocks": [prepare_block(b, D, n_heads) for b in params["blocks"]],
    }


def init_params(key, d_input, d_model, n_heads, n_layers, d_ff, n_outputs,
                max_len=1024):
    n_blocks = (n_layers + 3) // 2

    def lin(k, din, dout):
        kw, kb = jax.random.split(k)
        return (0.02 * jax.random.normal(kw, (din, dout), jnp.float32),
                0.02 * jax.random.normal(kb, (1, dout), jnp.float32))

    keys = jax.random.split(key, 3 + n_blocks)
    params = {}
    params["w_in"], params["b_in"] = lin(keys[0], d_input, d_model)
    params["pos"] = 0.02 * jax.random.normal(keys[1], (max_len, d_model), jnp.float32)
    params["ln_f_g"] = jnp.ones((1, d_model), jnp.float32)
    params["ln_f_b"] = jnp.zeros((1, d_model), jnp.float32)
    params["w_out"], params["b_out"] = lin(keys[2], d_model, n_outputs)

    blocks = []
    for i in range(n_blocks):
        bk = jax.random.split(keys[3 + i], 5)
        blk = {
            "ln1_g": jnp.ones((1, d_model), jnp.float32),
            "ln1_b": jnp.zeros((1, d_model), jnp.float32),
            "ln2_g": jnp.ones((1, d_model), jnp.float32),
            "ln2_b": jnp.zeros((1, d_model), jnp.float32),
        }
        blk["wqkv"], blk["bqkv"] = lin(bk[0], d_model, 3 * d_model)
        blk["wproj"], blk["bproj"] = lin(bk[1], d_model, d_model)
        blk["wsc"], blk["bsc"] = lin(bk[2], d_model, d_model)   # scale_combine (scales=[1])
        blk["w1"], blk["b1"] = lin(bk[3], d_model, d_ff)
        blk["w2"], blk["b2"] = lin(bk[4], d_ff, d_model)
        blocks.append(blk)
    params["blocks"] = blocks
    return params


def timeseries_decoder_forward(x, prepared, n_heads, n_layers):
    # Only the scales=[1] / use_relative_pos=False configuration is implemented.
    B, T, _ = x.shape
    D = prepared["w_in"].shape[1]

    h = input_projection(x, prepared["w_in"], prepared["b_in"], prepared["pos"][:T])
    h = h.reshape(B * T, D)                         # free contiguous merge of (B, T)

    mapping = create_layer_mapping(n_layers, len(prepared["blocks"]))
    for idx in mapping:
        h = decoder_block(h, prepared["blocks"][idx], B, T, n_heads)

    h_last = h.reshape(B, T, D)[:, -1, :]
    return final_head(h_last, prepared["ln_f_g"], prepared["ln_f_b"],
                      prepared["w_out"], prepared["b_out"])


# --------------------------------------------------------------------------- #
# pure-JAX f32 reference (unfolded weights) for a sanity check
# --------------------------------------------------------------------------- #
def ref_forward(x, params, n_heads, n_layers):
    def ln(z, g, b):
        mu = z.mean(-1, keepdims=True)
        var = ((z - mu) ** 2).mean(-1, keepdims=True)
        return (z - mu) / jnp.sqrt(var + _LN_EPS) * g + b

    def gelu(z):
        return 0.5 * z * (1.0 + jax.lax.erf(z / _SQRT2))

    B, T, _ = x.shape
    h = x @ params["w_in"] + params["b_in"] + params["pos"][:T]
    for idx in create_layer_mapping(n_layers, len(params["blocks"])):
        p = params["blocks"][idx]
        D = h.shape[-1]
        hd = D // n_heads
        xn = ln(h, p["ln1_g"], p["ln1_b"])
        qkv = xn @ p["wqkv"] + p["bqkv"]
        q, k, v = jnp.split(qkv, 3, axis=-1)
        q = q.reshape(B, T, n_heads, hd).transpose(0, 2, 1, 3)
        k = k.reshape(B, T, n_heads, hd).transpose(0, 2, 1, 3)
        v = v.reshape(B, T, n_heads, hd).transpose(0, 2, 1, 3)
        att = q @ k.transpose(0, 1, 3, 2) / jnp.sqrt(1.0 * hd)
        mask = jnp.tril(jnp.ones((T, T), bool))
        att = jnp.where(mask, att, -jnp.inf)
        att = jax.nn.softmax(att, -1)
        out = (att @ v).transpose(0, 2, 1, 3).reshape(B, T, D)
        out = out @ p["wproj"] + p["bproj"]
        out = out @ p["wsc"] + p["bsc"]
        h = h + out
        xn2 = ln(h, p["ln2_g"], p["ln2_b"])
        h1 = gelu(xn2 @ p["w1"] + p["b1"])
        h = h + h1 @ p["w2"] + p["b2"]
    hl = ln(h[:, -1], params["ln_f_g"], params["ln_f_b"])
    return hl @ params["w_out"] + params["b_out"]


# --------------------------------------------------------------------------- #
if __name__ == "__main__":
    # small, module-consistent shapes
    B, T = 2, 8
    d_input, d_model, n_heads, n_layers, d_ff, n_outputs = 3, 32, 4, 3, 64, 2

    key = jax.random.PRNGKey(0)
    kp, kx = jax.random.split(key)
    params = init_params(kp, d_input, d_model, n_heads, n_layers, d_ff, n_outputs)
    x = jax.random.normal(kx, (B, T, d_input), jnp.float32)

    # weight prep (QKV split, wproj@wsc fold, bf16 casts) runs ONCE, outside jit
    prepared = prepare_params(params, n_heads)

    fwd = jax.jit(lambda xx, pp: timeseries_decoder_forward(xx, pp, n_heads, n_layers))
    out = jax.block_until_ready(fwd(x, prepared))
    assert out.shape == (B, n_outputs), out.shape

    ref = jax.block_until_ready(ref_forward(x, params, n_heads, n_layers))
    # bf16 matmuls + folded wproj@wsc + approx reciprocal -> loosened tolerance.
    assert jnp.allclose(out, ref, atol=2e-2, rtol=2e-2), (out, ref)

    print("KERNEL_OK")
</pallas_src>

<mosaic_0001>
module attributes {stable_mosaic.version = 11 : i64} {
  func.func @input_proj_kernel(%arg0: i32, %arg1: i32, %arg2: memref<1x8x3xf32, #tpu.memory_space<vmem>>, %arg3: memref<3x32xf32, #tpu.memory_space<vmem>>, %arg4: memref<1x32xf32, #tpu.memory_space<vmem>>, %arg5: memref<8x32xf32, #tpu.memory_space<vmem>>, %arg6: memref<1x8x32xf32, #tpu.memory_space<vmem>>) attributes {dimension_semantics = [#tpu.dimension_semantics<parallel>, #tpu.dimension_semantics<parallel>], iteration_bounds = array<i64: 1, 2>, scalar_prefetch = 0 : i64, scratch_operands = 0 : i64, tpu.core_type = #tpu.core_type<tc>, window_params = [{transform_indices = @transform_0, window_bounds = array<i64: 1, 8, 3>}, {pipeline_mode = #tpu.pipeline_mode<synchronous>, transform_indices = @transform_1, window_bounds = array<i64: 3, 32>}, {pipeline_mode = #tpu.pipeline_mode<synchronous>, transform_indices = @transform_2, window_bounds = array<i64: 1, 32>}, {transform_indices = @transform_3, window_bounds = array<i64: 8, 32>}, {transform_indices = @transform_4, window_bounds = array<i64: 1, 8, 32>}]} {
    %c0 = arith.constant 0 : index
    %c0_0 = arith.constant 0 : index
    %c0_1 = arith.constant 0 : index
    %0 = vector.load %arg2[%c0, %c0_0, %c0_1] : memref<1x8x3xf32, #tpu.memory_space<vmem>>, vector<1x8x3xf32>
    %1 = vector.shape_cast %0 : vector<1x8x3xf32> to vector<8x3xf32>
    %c0_2 = arith.constant 0 : index
    %c0_3 = arith.constant 0 : index
    %2 = vector.load %arg5[%c0_2, %c0_3] : memref<8x32xf32, #tpu.memory_space<vmem>>, vector<8x32xf32>
    %c0_4 = arith.constant 0 : index
    %c0_5 = arith.constant 0 : index
    %3 = vector.load %arg4[%c0_4, %c0_5] : memref<1x32xf32, #tpu.memory_space<vmem>>, vector<1x32xf32>
    %4 = vector.broadcast %3 : vector<1x32xf32> to vector<8x32xf32>
    %5 = arith.addf %2, %4 : vector<8x32xf32>
    %6 = vector.extract_strided_slice %1 {offsets = [0, 0], sizes = [8, 1], strides = [1, 1]} : vector<8x3xf32> to vector<8x1xf32>
    %c0_6 = arith.constant 0 : index
    %c0_7 = arith.constant 0 : index
    %7 = vector.load %arg3[%c0_6, %c0_7] : memref<3x32xf32, #tpu.memory_space<vmem>>, vector<1x32xf32>
    %8 = vector.broadcast %6 : vector<8x1xf32> to vector<8x32xf32>
    %9 = vector.broadcast %7 : vector<1x32xf32> to vector<8x32xf32>
    %10 = arith.mulf %8, %9 : vector<8x32xf32>
    %11 = arith.addf %5, %10 : vector<8x32xf32>
    %12 = vector.extract_strided_slice %1 {offsets = [0, 1], sizes = [8, 1], strides = [1, 1]} : vector<8x3xf32> to vector<8x1xf32>
    %c1 = arith.constant 1 : index
    %c0_8 = arith.constant 0 : index
    %13 = vector.load %arg3[%c1, %c0_8] : memref<3x32xf32, #tpu.memory_space<vmem>>, vector<1x32xf32>
    %14 = vector.broadcast %12 : vector<8x1xf32> to vector<8x32xf32>
    %15 = vector.broadcast %13 : vector<1x32xf32> to vector<8x32xf32>
    %16 = arith.mulf %14, %15 : vector<8x32xf32>
    %17 = arith.addf %11, %16 : vector<8x32xf32>
    %18 = vector.extract_strided_slice %1 {offsets = [0, 2], sizes = [8, 1], strides = [1, 1]} : vector<8x3xf32> to vector<8x1xf32>
    %c2 = arith.constant 2 : index
    %c0_9 = arith.constant 0 : index
    %19 = vector.load %arg3[%c2, %c0_9] : memref<3x32xf32, #tpu.memory_space<vmem>>, vector<1x32xf32>
    %20 = vector.broadcast %18 : vector<8x1xf32> to vector<8x32xf32>
    %21 = vector.broadcast %19 : vector<1x32xf32> to vector<8x32xf32>
    %22 = arith.mulf %20, %21 : vector<8x32xf32>
    %23 = arith.addf %17, %22 : vector<8x32xf32>
    %c0_10 = arith.constant 0 : index
    %c0_11 = arith.constant 0 : index
    %c0_12 = arith.constant 0 : index
    %24 = vector.load %arg6[%c0_10, %c0_11, %c0_12] : memref<1x8x32xf32, #tpu.memory_space<vmem>>, vector<1x8x32xf32>
    %25 = vector.shape_cast %24 : vector<1x8x32xf32> to vector<8x32xf32>
    %26 = vector.shape_cast %23 : vector<8x32xf32> to vector<1x8x32xf32>
    tpu.vector_store %arg6[%c0_10, %c0_11, %c0_12], %26 {strides = array<i32>} : memref<1x8x32xf32, #tpu.memory_space<vmem>>, vector<1x8x32xf32>,
    return
  }
  func.func @transform_0(%arg0: i32, %arg1: i32) -> (i32, i32, i32) {
    %c0_i32 = arith.constant 0 : i32
    %c0_i32_0 = arith.constant 0 : i32
    return %arg1, %arg0, %c0_i32 : i32, i32, i32
  }
  func.func @transform_1(%arg0: i32, %arg1: i32) -> (i32, i32) {
    %c0_i32 = arith.constant 0 : i32
    %c0_i32_0 = arith.constant 0 : i32
    %c0_i32_1 = arith.constant 0 : i32
    return %c0_i32, %c0_i32_0 : i32, i32
  }
  func.func @transform_2(%arg0: i32, %arg1: i32) -> (i32, i32) {
    %c0_i32 = arith.constant 0 : i32
    %c0_i32_0 = arith.constant 0 : i32
    %c0_i32_1 = arith.constant 0 : i32
    return %c0_i32, %c0_i32_0 : i32, i32
  }
  func.func @transform_3(%arg0: i32, %arg1: i32) -> (i32, i32) {
    %c0_i32 = arith.constant 0 : i32
    %c0_i32_0 = arith.constant 0 : i32
    return %arg0, %c0_i32 : i32, i32
  }
  func.func @transform_4(%arg0: i32, %arg1: i32) -> (i32, i32, i32) {
    %c0_i32 = arith.constant 0 : i32
    %c0_i32_0 = arith.constant 0 : i32
    return %arg1, %arg0, %c0_i32 : i32, i32, i32
  }
}

module attributes {stable_mosaic.version = 11 : i64} {
  func.func @flash_attn_kernel(%arg0: i32, %arg1: i32, %arg2: i32, %arg3: i32, %arg4: memref<1x8x8xbf16, #tpu.memory_space<vmem>>, %arg5: memref<1x8x8xbf16, #tpu.memory_space<vmem>>, %arg6: memref<1x8x8xbf16, #tpu.memory_space<vmem>>, %arg7: memref<1x8x8xbf16, #tpu.memory_space<vmem>>, %arg8: memref<8x1xf32, #tpu.memory_space<vmem>>, %arg9: memref<8x1xf32, #tpu.memory_space<vmem>>, %arg10: memref<8x8xf32, #tpu.memory_space<vmem>>) attributes {dimension_semantics = [#tpu.dimension_semantics<parallel>, #tpu.dimension_semantics<parallel>, #tpu.dimension_semantics<parallel>, #tpu.dimension_semantics<arbitrary>], iteration_bounds = array<i64: 4, 2, 1, 1>, scalar_prefetch = 0 : i64, scratch_operands = 3 : i64, tpu.core_type = #tpu.core_type<tc>, window_params = [{transform_indices = @transform_0, window_bounds = array<i64: 1, 8, 8>}, {transform_indices = @transform_1, window_bounds = array<i64: 1, 8, 8>}, {transform_indices = @transform_2, window_bounds = array<i64: 1, 8, 8>}, {transform_indices = @transform_3, window_bounds = array<i64: 1, 8, 8>}]} {
    %c0_i32 = arith.constant 0 : i32
    %0 = arith.cmpi eq, %arg3, %c0_i32 : i32
    %1 = arith.extui %0 : i1 to i32
    %c0_i32_0 = arith.constant 0 : i32
    %2 = arith.cmpi ne, %1, %c0_i32_0 : i32
    scf.if %2 {
      %cst = arith.constant -1.000000e+30 : f32
      %12 = vector.broadcast %cst : f32 to vector<8x1xf32>
      %c0 = arith.constant 0 : index
      %c0_5 = arith.constant 0 : index
      %13 = vector.load %arg8[%c0, %c0_5] : memref<8x1xf32, #tpu.memory_space<vmem>>, vector<8x1xf32>
      tpu.vector_store %arg8[%c0, %c0_5], %12 {strides = array<i32>} : memref<8x1xf32, #tpu.memory_space<vmem>>, vector<8x1xf32>,
      %cst_6 = arith.constant 0.000000e+00 : f32
      %14 = vector.broadcast %cst_6 : f32 to vector<8x1xf32>
      %c0_7 = arith.constant 0 : index
      %c0_8 = arith.constant 0 : index
      %15 = vector.load %arg9[%c0_7, %c0_8] : memref<8x1xf32, #tpu.memory_space<vmem>>, vector<8x1xf32>
      tpu.vector_store %arg9[%c0_7, %c0_8], %14 {strides = array<i32>} : memref<8x1xf32, #tpu.memory_space<vmem>>, vector<8x1xf32>,
      %cst_9 = arith.constant 0.000000e+00 : f32
      %16 = vector.broadcast %cst_9 : f32 to vector<8x8xf32>
      %c0_10 = arith.constant 0 : index
      %c0_11 = arith.constant 0 : index
      %17 = vector.load %arg10[%c0_10, %c0_11] : memref<8x8xf32, #tpu.memory_space<vmem>>, vector<8x8xf32>
      tpu.vector_store %arg10[%c0_10, %c0_11], %16 {strides = array<i32>} : memref<8x8xf32, #tpu.memory_space<vmem>>, vector<8x8xf32>,
    } else {
    }
    %c8_i32 = arith.constant 8 : i32
    %3 = arith.muli %arg3, %c8_i32 : i32
    %c8_i32_1 = arith.constant 8 : i32
    %4 = arith.muli %arg2, %c8_i32_1 : i32
    %c7_i32 = arith.constant 7 : i32
    %5 = arith.addi %4, %c7_i32 : i32
    %6 = arith.cmpi sle, %3, %5 : i32
    %7 = arith.extui %6 : i1 to i32
    %c0_i32_2 = arith.constant 0 : i32
    %8 = arith.cmpi ne, %7, %c0_i32_2 : i32
    scf.if %8 {
      %c0 = arith.constant 0 : index
      %c0_5 = arith.constant 0 : index
      %c0_6 = arith.constant 0 : index
      %12 = vector.load %arg4[%c0, %c0_5, %c0_6] : memref<1x8x8xbf16, #tpu.memory_space<vmem>>, vector<1x8x8xbf16>
      %13 = vector.shape_cast %12 : vector<1x8x8xbf16> to vector<8x8xbf16>
      %c0_7 = arith.constant 0 : index
      %c0_8 = arith.constant 0 : index
      %c0_9 = arith.constant 0 : index
      %14 = vector.load %arg5[%c0_7, %c0_8, %c0_9] : memref<1x8x8xbf16, #tpu.memory_space<vmem>>, vector<1x8x8xbf16>
      %15 = vector.shape_cast %14 : vector<1x8x8xbf16> to vector<8x8xbf16>
      %c0_10 = arith.constant 0 : index
      %c0_11 = arith.constant 0 : index
      %c0_12 = arith.constant 0 : index
      %16 = vector.load %arg6[%c0_10, %c0_11, %c0_12] : memref<1x8x8xbf16, #tpu.memory_space<vmem>>, vector<1x8x8xbf16>
      %17 = vector.shape_cast %16 : vector<1x8x8xbf16> to vector<8x8xbf16>
      %cst = arith.constant dense<0.000000e+00> : vector<8x8xf32>
      %18 = tpu.matmul %13, %15, %cst {dimension_numbers = #tpu.dot_dimension_numbers<[1], [1], [0], [0], [0, 0, 1, 0], [], []>} : vector<8x8xbf16>, vector<8x8xbf16>, vector<8x8xf32> -> vector<8x8xf32>
      %cst_13 = arith.constant 0.353553385 : f32
      %19 = vector.broadcast %cst_13 : f32 to vector<8x8xf32>
      %20 = arith.mulf %18, %19 : vector<8x8xf32>
      %c8_i32_14 = arith.constant 8 : i32
      %21 = arith.muli %arg2, %c8_i32_14 : i32
      %22 = tpu.iota {dimensions = array<i32: 0>} : vector<8x8xi32>
      %23 = vector.broadcast %21 : i32 to vector<8x8xi32>
      %24 = arith.addi %23, %22 : vector<8x8xi32>
      %c8_i32_15 = arith.constant 8 : i32
      %25 = arith.muli %arg3, %c8_i32_15 : i32
      %26 = tpu.iota {dimensions = array<i32: 1>} : vector<8x8xi32>
      %27 = vector.broadcast %25 : i32 to vector<8x8xi32>
      %28 = arith.addi %27, %26 : vector<8x8xi32>
      %29 = arith.cmpi sle, %28, %24 : vector<8x8xi32>
      %cst_16 = arith.constant -1.000000e+30 : f32
      %30 = vector.broadcast %cst_16 : f32 to vector<8x8xf32>
      %31 = arith.select %29, %20, %30 : vector<8x8xi1>, vector<8x8xf32>
      %c0_17 = arith.constant 0 : index
      %c0_18 = arith.constant 0 : index
      %32 = vector.load %arg8[%c0_17, %c0_18] : memref<8x1xf32, #tpu.memory_space<vmem>>, vector<8x1xf32>
      %cst_19 = arith.constant dense<0xFF800000> : vector<8xf32>
      %33 = vector.multi_reduction <maximumf>, %31, %cst_19 [1] : vector<8x8xf32> to vector<8xf32>
      %34 = vector.shape_cast %33 : vector<8xf32> to vector<8x1xf32>
      %35 = arith.maximumf %32, %34 : vector<8x1xf32>
      %36 = arith.subf %32, %35 : vector<8x1xf32>
      %37 = math.exp %36 : vector<8x1xf32>
      %38 = vector.broadcast %35 : vector<8x1xf32> to vector<8x8xf32>
      %39 = arith.subf %31, %38 : vector<8x8xf32>
      %40 = math.exp %39 : vector<8x8xf32>
      %c0_20 = arith.constant 0 : index
      %c0_21 = arith.constant 0 : index
      %41 = vector.load %arg9[%c0_20, %c0_21] : memref<8x1xf32, #tpu.memory_space<vmem>>, vector<8x1xf32>
      %42 = arith.mulf %37, %41 : vector<8x1xf32>
      %cst_22 = arith.constant dense<0.000000e+00> : vector<8xf32>
      %43 = vector.multi_reduction <add>, %40, %cst_22 [1] : vector<8x8xf32> to vector<8xf32>
      %44 = vector.shape_cast %43 : vector<8xf32> to vector<8x1xf32>
      %45 = arith.addf %42, %44 : vector<8x1xf32>
      %c0_23 = arith.constant 0 : index
      %c0_24 = arith.constant 0 : index
      %46 = vector.load %arg9[%c0_23, %c0_24] : memref<8x1xf32, #tpu.memory_space<vmem>>, vector<8x1xf32>
      tpu.vector_store %arg9[%c0_23, %c0_24], %45 {strides = array<i32>} : memref<8x1xf32, #tpu.memory_space<vmem>>, vector<8x1xf32>,
      %c0_25 = arith.constant 0 : index
      %c0_26 = arith.constant 0 : index
      %47 = vector.load %arg10[%c0_25, %c0_26] : memref<8x8xf32, #tpu.memory_space<vmem>>, vector<8x8xf32>
      %48 = vector.broadcast %37 : vector<8x1xf32> to vector<8x8xf32>
      %49 = arith.mulf %48, %47 : vector<8x8xf32>
      %50 = arith.truncf %40 : vector<8x8xf32> to vector<8x8xbf16>
      %cst_27 = arith.constant dense<0.000000e+00> : vector<8x8xf32>
      %51 = tpu.matmul %50, %17, %cst_27 {dimension_numbers = #tpu.dot_dimension_numbers<[1], [0], [0], [1], [0, 0, 1, 1], [], []>} : vector<8x8xbf16>, vector<8x8xbf16>, vector<8x8xf32> -> vector<8x8xf32>
      %52 = arith.addf %49, %51 : vector<8x8xf32>
      %c0_28 = arith.constant 0 : index
      %c0_29 = arith.constant 0 : index
      %53 = vector.load %arg10[%c0_28, %c0_29] : memref<8x8xf32, #tpu.memory_space<vmem>>, vector<8x8xf32>
      tpu.vector_store %arg10[%c0_28, %c0_29], %52 {strides = array<i32>} : memref<8x8xf32, #tpu.memory_space<vmem>>, vector<8x8xf32>,
      %c0_30 = arith.constant 0 : index
      %c0_31 = arith.constant 0 : index
      %54 = vector.load %arg8[%c0_30, %c0_31] : memref<8x1xf32, #tpu.memory_space<vmem>>, vector<8x1xf32>
      tpu.vector_store %arg8[%c0_30, %c0_31], %35 {strides = array<i32>} : memref<8x1xf32, #tpu.memory_space<vmem>>, vector<8x1xf32>,
    } else {
    }
    %c0_i32_3 = arith.constant 0 : i32
    %9 = arith.cmpi eq, %arg3, %c0_i32_3 : i32
    %10 = arith.extui %9 : i1 to i32
    %c0_i32_4 = arith.constant 0 : i32
    %11 = arith.cmpi ne, %10, %c0_i32_4 : i32
    scf.if %11 {
      %c0 = arith.constant 0 : index
      %c0_5 = arith.constant 0 : index
      %12 = vector.load %arg9[%c0, %c0_5] : memref<8x1xf32, #tpu.memory_space<vmem>>, vector<8x1xf32>
      %13 = tpu.reciprocal %12 {approx = true} : vector<8x1xf32> -> vector<8x1xf32>
      %c0_6 = arith.constant 0 : index
      %c0_7 = arith.constant 0 : index
      %14 = vector.load %arg10[%c0_6, %c0_7] : memref<8x8xf32, #tpu.memory_space<vmem>>, vector<8x8xf32>
      %15 = vector.broadcast %13 : vector<8x1xf32> to vector<8x8xf32>
      %16 = arith.mulf %14, %15 : vector<8x8xf32>
      %17 = arith.truncf %16 : vector<8x8xf32> to vector<8x8xbf16>
      %c0_8 = arith.constant 0 : index
      %c0_9 = arith.constant 0 : index
      %c0_10 = arith.constant 0 : index
      %18 = vector.load %arg7[%c0_8, %c0_9, %c0_10] : memref<1x8x8xbf16, #tpu.memory_space<vmem>>, vector<1x8x8xbf16>
      %19 = vector.shape_cast %18 : vector<1x8x8xbf16> to vector<8x8xbf16>
      %20 = vector.shape_cast %17 : vector<8x8xbf16> to vector<1x8x8xbf16>
      tpu.vector_store %arg7[%c0_8, %c0_9, %c0_10], %20 {strides = array<i32>} : memref<1x8x8xbf16, #tpu.memory_space<vmem>>, vector<1x8x8xbf16>,
    } else {
    }
    return
  }
  func.func @transform_0(%arg0: i32, %arg1: i32, %arg2: i32, %arg3: i32) -> (i32, i32, i32) {
    %c1_i32 = arith.constant 1 : i32
    %0 = arith.muli %arg1, %c1_i32 : i32
    %1 = arith.addi %0, %arg2 : i32
    %c0_i32 = arith.constant 0 : i32
    %c0_i32_0 = arith.constant 0 : i32
    return %arg0, %1, %c0_i32 : i32, i32, i32
  }
  func.func @transform_1(%arg0: i32, %arg1: i32, %arg2: i32, %arg3: i32) -> (i32, i32, i32) {
    %c1_i32 = arith.constant 1 : i32
    %0 = arith.muli %arg1, %c1_i32 : i32
    %1 = arith.addi %0, %arg3 : i32
    %c0_i32 = arith.constant 0 : i32
    %c0_i32_0 = arith.constant 0 : i32
    return %arg0, %1, %c0_i32 : i32, i32, i32
  }
  func.func @transform_2(%arg0: i32, %arg1: i32, %arg2: i32, %arg3: i32) -> (i32, i32, i32) {
    %c1_i32 = arith.constant 1 : i32
    %0 = arith.muli %arg1, %c1_i32 : i32
    %1 = arith.addi %0, %arg3 : i32
    %c0_i32 = arith.constant 0 : i32
    %c0_i32_0 = arith.constant 0 : i32
    return %arg0, %1, %c0_i32 : i32, i32, i32
  }
  func.func @transform_3(%arg0: i32, %arg1: i32, %arg2: i32, %arg3: i32) -> (i32, i32, i32) {
    %c1_i32 = arith.constant 1 : i32
    %0 = arith.muli %arg1, %c1_i32 : i32
    %1 = arith.addi %0, %arg2 : i32
    %c0_i32 = arith.constant 0 : i32
    %c0_i32_0 = arith.constant 0 : i32
    return %arg0, %1, %c0_i32 : i32, i32, i32
  }
}

module attributes {stable_mosaic.version = 11 : i64} {
  func.func @ln_qkv_kernel(%arg0: i32, %arg1: memref<16x32xf32, #tpu.memory_space<vmem>>, %arg2: memref<1x32xf32, #tpu.memory_space<vmem>>, %arg3: memref<1x32xf32, #tpu.memory_space<vmem>>, %arg4: memref<4x32x8xbf16, #tpu.memory_space<vmem>>, %arg5: memref<4x32x8xbf16, #tpu.memory_space<vmem>>, %arg6: memref<4x32x8xbf16, #tpu.memory_space<vmem>>, %arg7: memref<4x1x8xf32, #tpu.memory_space<vmem>>, %arg8: memref<4x1x8xf32, #tpu.memory_space<vmem>>, %arg9: memref<4x1x8xf32, #tpu.memory_space<vmem>>, %arg10: memref<4x16x8xbf16, #tpu.memory_space<vmem>>, %arg11: memref<4x16x8xbf16, #tpu.memory_space<vmem>>, %arg12: memref<4x16x8xbf16, #tpu.memory_space<vmem>>) attributes {dimension_semantics = [#tpu.dimension_semantics<parallel>], iteration_bounds = array<i64: 1>, scalar_prefetch = 0 : i64, scratch_operands = 0 : i64, tpu.core_type = #tpu.core_type<tc>, window_params = [{transform_indices = @transform_0, window_bounds = array<i64: 16, 32>}, {pipeline_mode = #tpu.pipeline_mode<synchronous>, transform_indices = @transform_1, window_bounds = array<i64: 1, 32>}, {pipeline_mode = #tpu.pipeline_mode<synchronous>, transform_indices = @transform_2, window_bounds = array<i64: 1, 32>}, {pipeline_mode = #tpu.pipeline_mode<synchronous>, transform_indices = @transform_3, window_bounds = array<i64: 4, 32, 8>}, {pipeline_mode = #tpu.pipeline_mode<synchronous>, transform_indices = @transform_4, window_bounds = array<i64: 4, 32, 8>}, {pipeline_mode = #tpu.pipeline_mode<synchronous>, transform_indices = @transform_5, window_bounds = array<i64: 4, 32, 8>}, {pipeline_mode = #tpu.pipeline_mode<synchronous>, transform_indices = @transform_6, window_bounds = array<i64: 4, 1, 8>}, {pipeline_mode = #tpu.pipeline_mode<synchronous>, transform_indices = @transform_7, window_bounds = array<i64: 4, 1, 8>}, {pipeline_mode = #tpu.pipeline_mode<synchronous>, transform_indices = @transform_8, window_bounds = array<i64: 4, 1, 8>}, {transform_indices = @transform_9, window_bounds = array<i64: 4, 16, 8>}, {transform_indices = @transform_10, window_bounds = array<i64: 4, 16, 8>}, {transform_indices = @transform_11, window_bounds = array<i64: 4, 16, 8>}]} {
    %c0 = arith.constant 0 : index
    %c0_0 = arith.constant 0 : index
    %0 = vector.load %arg1[%c0, %c0_0] : memref<16x32xf32, #tpu.memory_space<vmem>>, vector<16x32xf32>
    %c0_1 = arith.constant 0 : index
    %c0_2 = arith.constant 0 : index
    %1 = vector.load %arg2[%c0_1, %c0_2] : memref<1x32xf32, #tpu.memory_space<vmem>>, vector<1x32xf32>
    %c0_3 = arith.constant 0 : index
    %c0_4 = arith.constant 0 : index
    %2 = vector.load %arg3[%c0_3, %c0_4] : memref<1x32xf32, #tpu.memory_space<vmem>>, vector<1x32xf32>
    %cst = arith.constant dense<0.000000e+00> : vector<16xf32>
    %3 = vector.multi_reduction <add>, %0, %cst [1] : vector<16x32xf32> to vector<16xf32>
    %4 = vector.shape_cast %3 : vector<16xf32> to vector<16x1xf32>
    %cst_5 = arith.constant 3.200000e+01 : f32
    %5 = vector.broadcast %cst_5 : f32 to vector<16x1xf32>
    %6 = arith.divf %4, %5 : vector<16x1xf32>
    %7 = vector.broadcast %6 : vector<16x1xf32> to vector<16x32xf32>
    %8 = arith.subf %0, %7 : vector<16x32xf32>
    %9 = arith.mulf %8, %8 : vector<16x32xf32>
    %cst_6 = arith.constant dense<0.000000e+00> : vector<16xf32>
    %10 = vector.multi_reduction <add>, %9, %cst_6 [1] : vector<16x32xf32> to vector<16xf32>
    %11 = vector.shape_cast %10 : vector<16xf32> to vector<16x1xf32>
    %cst_7 = arith.constant 3.200000e+01 : f32
    %12 = vector.broadcast %cst_7 : f32 to vector<16x1xf32>
    %13 = arith.divf %11, %12 : vector<16x1xf32>
    %14 = vector.broadcast %6 : vector<16x1xf32> to vector<16x32xf32>
    %15 = arith.subf %0, %14 : vector<16x32xf32>
    %cst_8 = arith.constant 9.99999974E-6 : f32
    %16 = vector.broadcast %cst_8 : f32 to vector<16x1xf32>
    %17 = arith.addf %13, %16 : vector<16x1xf32>
    %18 = math.rsqrt %17 : vector<16x1xf32>
    %19 = vector.broadcast %18 : vector<16x1xf32> to vector<16x32xf32>
    %20 = arith.mulf %15, %19 : vector<16x32xf32>
    %21 = vector.broadcast %1 : vector<1x32xf32> to vector<16x32xf32>
    %22 = arith.mulf %20, %21 : vector<16x32xf32>
    %23 = vector.broadcast %2 : vector<1x32xf32> to vector<16x32xf32>
    %24 = arith.addf %22, %23 : vector<16x32xf32>
    %25 = arith.truncf %24 : vector<16x32xf32> to vector<16x32xbf16>
    %c0_9 = arith.constant 0 : index
    %c0_10 = arith.constant 0 : index
    %c0_11 = arith.constant 0 : index
    %26 = vector.load %arg4[%c0_9, %c0_10, %c0_11] : memref<4x32x8xbf16, #tpu.memory_space<vmem>>, vector<1x32x8xbf16>
    %27 = vector.shape_cast %26 : vector<1x32x8xbf16> to vector<32x8xbf16>
    %cst_12 = arith.constant dense<0.000000e+00> : vector<16x8xf32>
    %28 = tpu.matmul %25, %27, %cst_12 {dimension_numbers = #tpu.dot_dimension_numbers<[1], [0], [0], [1], [0, 0, 1, 1], [], []>} : vector<16x32xbf16>, vector<32x8xbf16>, vector<16x8xf32> -> vector<16x8xf32>
    %c0_13 = arith.constant 0 : index
    %c0_14 = arith.constant 0 : index
    %c0_15 = arith.constant 0 : index
    %29 = vector.load %arg7[%c0_13, %c0_14, %c0_15] : memref<4x1x8xf32, #tpu.memory_space<vmem>>, vector<1x1x8xf32>
    %30 = vector.shape_cast %29 : vector<1x1x8xf32> to vector<1x8xf32>
    %31 = vector.broadcast %30 : vector<1x8xf32> to vector<16x8xf32>
    %32 = arith.addf %28, %31 : vector<16x8xf32>
    %c0_16 = arith.constant 0 : index
    %c0_17 = arith.constant 0 : index
    %c0_18 = arith.constant 0 : index
    %33 = vector.load %arg5[%c0_16, %c0_17, %c0_18] : memref<4x32x8xbf16, #tpu.memory_space<vmem>>, vector<1x32x8xbf16>
    %34 = vector.shape_cast %33 : vector<1x32x8xbf16> to vector<32x8xbf16>
    %cst_19 = arith.constant dense<0.000000e+00> : vector<16x8xf32>
    %35 = tpu.matmul %25, %34, %cst_19 {dimension_numbers = #tpu.dot_dimension_numbers<[1], [0], [0], [1], [0, 0, 1, 1], [], []>} : vector<16x32xbf16>, vector<32x8xbf16>, vector<16x8xf32> -> vector<16x8xf32>
    %c0_20 = arith.constant 0 : index
    %c0_21 = arith.constant 0 : index
    %c0_22 = arith.constant 0 : index
    %36 = vector.load %arg8[%c0_20, %c0_21, %c0_22] : memref<4x1x8xf32, #tpu.memory_space<vmem>>, vector<1x1x8xf32>
    %37 = vector.shape_cast %36 : vector<1x1x8xf32> to vector<1x8xf32>
    %38 = vector.broadcast %37 : vector<1x8xf32> to vector<16x8xf32>
    %39 = arith.addf %35, %38 : vector<16x8xf32>
    %c0_23 = arith.constant 0 : index
    %c0_24 = arith.constant 0 : index
    %c0_25 = arith.constant 0 : index
    %40 = vector.load %arg6[%c0_23, %c0_24, %c0_25] : memref<4x32x8xbf16, #tpu.memory_space<vmem>>, vector<1x32x8xbf16>
    %41 = vector.shape_cast %40 : vector<1x32x8xbf16> to vector<32x8xbf16>
    %cst_26 = arith.constant dense<0.000000e+00> : vector<16x8xf32>
    %42 = tpu.matmul %25, %41, %cst_26 {dimension_numbers = #tpu.dot_dimension_numbers<[1], [0], [0], [1], [0, 0, 1, 1], [], []>} : vector<16x32xbf16>, vector<32x8xbf16>, vector<16x8xf32> -> vector<16x8xf32>
    %c0_27 = arith.constant 0 : index
    %c0_28 = arith.constant 0 : index
    %c0_29 = arith.constant 0 : index
    %43 = vector.load %arg9[%c0_27, %c0_28, %c0_29] : memref<4x1x8xf32, #tpu.memory_space<vmem>>, vector<1x1x8xf32>
    %44 = vector.shape_cast %43 : vector<1x1x8xf32> to vector<1x8xf32>
    %45 = vector.broadcast %44 : vector<1x8xf32> to vector<16x8xf32>
    %46 = arith.addf %42, %45 : vector<16x8xf32>
    %47 = arith.truncf %32 : vector<16x8xf32> to vector<16x8xbf16>
    %c0_30 = arith.constant 0 : index
    %c0_31 = arith.constant 0 : index
    %c0_32 = arith.constant 0 : index
    %48 = vector.load %arg10[%c0_30, %c0_31, %c0_32] : memref<4x16x8xbf16, #tpu.memory_space<vmem>>, vector<1x16x8xbf16>
    %49 = vector.shape_cast %48 : vector<1x16x8xbf16> to vector<16x8xbf16>
    %50 = vector.shape_cast %47 : vector<16x8xbf16> to vector<1x16x8xbf16>
    tpu.vector_store %arg10[%c0_30, %c0_31, %c0_32], %50 {strides = array<i32>} : memref<4x16x8xbf16, #tpu.memory_space<vmem>>, vector<1x16x8xbf16>,
    %51 = arith.truncf %39 : vector<16x8xf32> to vector<16x8xbf16>
    %c0_33 = arith.constant 0 : index
    %c0_34 = arith.constant 0 : index
    %c0_35 = arith.constant 0 : index
    %52 = vector.load %arg11[%c0_33, %c0_34, %c0_35] : memref<4x16x8xbf16, #tpu.memory_space<vmem>>, vector<1x16x8xbf16>
    %53 = vector.shape_cast %52 : vector<1x16x8xbf16> to vector<16x8xbf16>
    %54 = vector.shape_cast %51 : vector<16x8xbf16> to vector<1x16x8xbf16>
    tpu.vector_store %arg11[%c0_33, %c0_34, %c0_35], %54 {strides = array<i32>} : memref<4x16x8xbf16, #tpu.memory_space<vmem>>, vector<1x16x8xbf16>,
    %55 = arith.truncf %46 : vector<16x8xf32> to vector<16x8xbf16>
    %c0_36 = arith.constant 0 : index
    %c0_37 = arith.constant 0 : index
    %c0_38 = arith.constant 0 : index
    %56 = vector.load %arg12[%c0_36, %c0_37, %c0_38] : memref<4x16x8xbf16, #tpu.memory_space<vmem>>, vector<1x16x8xbf16>
    %57 = vector.shape_cast %56 : vector<1x16x8xbf16> to vector<16x8xbf16>
    %58 = vector.shape_cast %55 : vector<16x8xbf16> to vector<1x16x8xbf16>
    tpu.vector_store %arg12[%c0_36, %c0_37, %c0_38], %58 {strides = array<i32>} : memref<4x16x8xbf16, #tpu.memory_space<vmem>>, vector<1x16x8xbf16>,
    %c1 = arith.constant 1 : index
    %c0_39 = arith.constant 0 : index
    %c0_40 = arith.constant 0 : index
    %59 = vector.load %arg4[%c1, %c0_39, %c0_40] : memref<4x32x8xbf16, #tpu.memory_space<vmem>>, vector<1x32x8xbf16>
    %60 = vector.shape_cast %59 : vector<1x32x8xbf16> to vector<32x8xbf16>
    %cst_41 = arith.constant dense<0.000000e+00> : vector<16x8xf32>
    %61 = tpu.matmul %25, %60, %cst_41 {dimension_numbers = #tpu.dot_dimension_numbers<[1], [0], [0], [1], [0, 0, 1, 1], [], []>} : vector<16x32xbf16>, vector<32x8xbf16>, vector<16x8xf32> -> vector<16x8xf32>
    %c1_42 = arith.constant 1 : index
    %c0_43 = arith.constant 0 : index
    %c0_44 = arith.constant 0 : index
    %62 = vector.load %arg7[%c1_42, %c0_43, %c0_44] : memref<4x1x8xf32, #tpu.memory_space<vmem>>, vector<1x1x8xf32>
    %63 = vector.shape_cast %62 : vector<1x1x8xf32> to vector<1x8xf32>
    %64 = vector.broadcast %63 : vector<1x8xf32> to vector<16x8xf32>
    %65 = arith.addf %61, %64 : vector<16x8xf32>
    %c1_45 = arith.constant 1 : index
    %c0_46 = arith.constant 0 : index
    %c0_47 = arith.constant 0 : index
    %66 = vector.load %arg5[%c1_45, %c0_46, %c0_47] : memref<4x32x8xbf16, #tpu.memory_space<vmem>>, vector<1x32x8xbf16>
    %67 = vector.shape_cast %66 : vector<1x32x8xbf16> to vector<32x8xbf16>
    %cst_48 = arith.constant dense<0.000000e+00> : vector<16x8xf32>
    %68 = tpu.matmul %25, %67, %cst_48 {dimension_numbers = #tpu.dot_dimension_numbers<[1], [0], [0], [1], [0, 0, 1, 1], [], []>} : vector<16x32xbf16>, vector<32x8xbf16>, vector<16x8xf32> -> vector<16x8xf32>
    %c1_49 = arith.constant 1 : index
    %c0_50 = arith.constant 0 : index
    %c0_51 = arith.constant 0 : index
    %69 = vector.load %arg8[%c1_49, %c0_50, %c0_51] : memref<4x1x8xf32, #tpu.memory_space<vmem>>, vector<1x1x8xf32>
    %70 = vector.shape_cast %69 : vector<1x1x8xf32> to vector<1x8xf32>
    %71 = vector.broadcast %70 : vector<1x8xf32> to vector<16x8xf32>
    %72 = arith.addf %68, %71 : vector<16x8xf32>
    %c1_52 = arith.constant 1 : index
    %c0_53 = arith.constant 0 : index
    %c0_54 = arith.constant 0 : index
    %73 = vector.load %arg6[%c1_52, %c0_53, %c0_54] : memref<4x32x8xbf16, #tpu.memory_space<vmem>>, vector<1x32x8xbf16>
    %74 = vector.shape_cast %73 : vector<1x32x8xbf16> to vector<32x8xbf16>
    %cst_55 = arith.constant dense<0.000000e+00> : vector<16x8xf32>
    %75 = tpu.matmul %25, %74, %cst_55 {dimension_numbers = #tpu.dot_dimension_numbers<[1], [0], [0], [1], [0, 0, 1, 1], [], []>} : vector<16x32xbf16>, vector<32x8xbf16>, vector<16x8xf32> -> vector<16x8xf32>
    %c1_56 = arith.constant 1 : index
    %c0_57 = arith.constant 0 : index
    %c0_58 = arith.constant 0 : index
    %76 = vector.load %arg9[%c1_56, %c0_57, %c0_58] : memref<4x1x8xf32, #tpu.memory_space<vmem>>, vector<1x1x8xf32>
    %77 = vector.shape_cast %76 : vector<1x1x8xf32> to vector<1x8xf32>
    %78 = vector.broadcast %77 : vector<1x8xf32> to vector<16x8xf32>
    %79 = arith.addf %75, %78 : vector<16x8xf32>
    %80 = arith.truncf %65 : vector<16x8xf32> to vector<16x8xbf16>
    %c1_59 = arith.constant 1 : index
    %c0_60 = arith.constant 0 : index
    %c0_61 = arith.constant 0 : index
    %81 = vector.load %arg10[%c1_59, %c0_60, %c0_61] : memref<4x16x8xbf16, #tpu.memory_space<vmem>>, vector<1x16x8xbf16>
    %82 = vector.shape_cast %81 : vector<1x16x8xbf16> to vector<16x8xbf16>
    %83 = vector.shape_cast %80 : vector<16x8xbf16> to vector<1x16x8xbf16>
    tpu.vector_store %arg10[%c1_59, %c0_60, %c0_61], %83 {strides = array<i32>} : memref<4x16x8xbf16, #tpu.memory_space<vmem>>, vector<1x16x8xbf16>,
    %84 = arith.truncf %72 : vector<16x8xf32> to vector<16x8xbf16>
    %c1_62 = arith.constant 1 : index
    %c0_63 = arith.constant 0 : index
    %c0_64 = arith.constant 0 : index
    %85 = vector.load %arg11[%c1_62, %c0_63, %c0_64] : memref<4x16x8xbf16, #tpu.memory_space<vmem>>, vector<1x16x8xbf16>
    %86 = vector.shape_cast %85 : vector<1x16x8xbf16> to vector<16x8xbf16>
    %87 = vector.shape_cast %84 : vector<16x8xbf16> to vector<1x16x8xbf16>
    tpu.vector_store %arg11[%c1_62, %c0_63, %c0_64], %87 {strides = array<i32>} : memref<4x16x8xbf16, #tpu.memory_space<vmem>>, vector<1x16x8xbf16>,
    %88 = arith.truncf %79 : vector<16x8xf32> to vector<16x8xbf16>
    %c1_65 = arith.constant 1 : index
    %c0_66 = arith.constant 0 : index
    %c0_67 = arith.constant 0 : index
    %89 = vector.load %arg12[%c1_65, %c0_66, %c0_67] : memref<4x16x8xbf16, #tpu.memory_space<vmem>>, vector<1x16x8xbf16>
    %90 = vector.shape_cast %89 : vector<1x16x8xbf16> to vector<16x8xbf16>
    %91 = vector.shape_cast %88 : vector<16x8xbf16> to vector<1x16x8xbf16>
    tpu.vector_store %arg12[%c1_65, %c0_66, %c0_67], %91 {strides = array<i32>} : memref<4x16x8xbf16, #tpu.memory_space<vmem>>, vector<1x16x8xbf16>,
    %c2 = arith.constant 2 : index
    %c0_68 = arith.constant 0 : index
    %c0_69 = arith.constant 0 : index
    %92 = vector.load %arg4[%c2, %c0_68, %c0_69] : memref<4x32x8xbf16, #tpu.memory_space<vmem>>, vector<1x32x8xbf16>
    %93 = vector.shape_cast %92 : vector<1x32x8xbf16> to vector<32x8xbf16>
    %cst_70 = arith.constant dense<0.000000e+00> : vector<16x8xf32>
    %94 = tpu.matmul %25, %93, %cst_70 {dimension_numbers = #tpu.dot_dimension_numbers<[1], [0], [0], [1], [0, 0, 1, 1], [], []>} : vector<16x32xbf16>, vector<32x8xbf16>, vector<16x8xf32> -> vector<16x8xf32>
    %c2_71 = arith.constant 2 : index
    %c0_72 = arith.constant 0 : index
    %c0_73 = arith.constant 0 : index
    %95 = vector.load %arg7[%c2_71, %c0_72, %c0_73] : memref<4x1x8xf32, #tpu.memory_space<vmem>>, vector<1x1x8xf32>
    %96 = vector.shape_cast %95 : vector<1x1x8xf32> to vector<1x8xf32>
    %97 = vector.broadcast %96 : vector<1x8xf32> to vector<16x8xf32>
    %98 = arith.addf %94, %97 : vector<16x8xf32>
    %c2_74 = arith.constant 2 : index
    %c0_75 = arith.constant 0 : index
    %c0_76 = arith.constant 0 : index
    %99 = vector.load %arg5[%c2_74, %c0_75, %c0_76] : memref<4x32x8xbf16, #tpu.memory_space<vmem>>, vector<1x32x8xbf16>
    %100 = vector.shape_cast %99 : vector<1x32x8xbf16> to vector<32x8xbf16>
    %cst_77 = arith.constant dense<0.000000e+00> : vector<16x8xf32>
    %101 = tpu.matmul %25, %100, %cst_77 {dimension_numbers = #tpu.dot_dimension_numbers<[1], [0], [0], [1], [0, 0, 1, 1], [], []>} : vector<16x32xbf16>, vector<32x8xbf16>, vector<16x8xf32> -> vector<16x8xf32>
    %c2_78 = arith.constant 2 : index
    %c0_79 = arith.constant 0 : index
    %c0_80 = arith.constant 0 : index
    %102 = vector.load %arg8[%c2_78, %c0_79, %c0_80] : memref<4x1x8xf32, #tpu.memory_space<vmem>>, vector<1x1x8xf32>
    %103 = vector.shape_cast %102 : vector<1x1x8xf32> to vector<1x8xf32>
    %104 = vector.broadcast %103 : vector<1x8xf32> to vector<16x8xf32>
    %105 = arith.addf %101, %104 : vector<16x8xf32>
    %c2_81 = arith.constant 2 : index
    %c0_82 = arith.constant 0 : index
    %c0_83 = arith.constant 0 : index
    %106 = vector.load %arg6[%c2_81, %c0_82, %c0_83] : memref<4x32x8xbf16, #tpu.memory_space<vmem>>, vector<1x32x8xbf16>
    %107 = vector.shape_cast %106 : vector<1x32x8xbf16> to vector<32x8xbf16>
    %cst_84 = arith.constant dense<0.000000e+00> : vector<16x8xf32>
    %108 = tpu.matmul %25, %107, %cst_84 {dimension_numbers = #tpu.dot_dimension_numbers<[1], [0], [0], [1], [0, 0, 1, 1], [], []>} : vector<16x32xbf16>, vector<32x8xbf16>, vector<16x8xf32> -> vector<16x8xf32>
    %c2_85 = arith.constant 2 : index
    %c0_86 = arith.constant 0 : index
    %c0_87 = arith.constant 0 : index
    %109 = vector.load %arg9[%c2_85, %c0_86, %c0_87] : memref<4x1x8xf32, #tpu.memory_space<vmem>>, vector<1x1x8xf32>
    %110 = vector.shape_cast %109 : vector<1x1x8xf32> to vector<1x8xf32>
    %111 = vector.broadcast %110 : vector<1x8xf32> to vector<16x8xf32>
    %112 = arith.addf %108, %111 : vector<16x8xf32>
    %113 = arith.truncf %98 : vector<16x8xf32> to vector<16x8xbf16>
    %c2_88 = arith.constant 2 : index
    %c0_89 = arith.constant 0 : index
    %c0_90 = arith.constant 0 : index
    %114 = vector.load %arg10[%c2_88, %c0_89, %c0_90] : memref<4x16x8xbf16, #tpu.memory_space<vmem>>, vector<1x16x8xbf16>
    %115 = vector.shape_cast %114 : vector<1x16x8xbf16> to vector<16x8xbf16>
    %116 = vector.shape_cast %113 : vector<16x8xbf16> to vector<1x16x8xbf16>
    tpu.vector_store %arg10[%c2_88, %c0_89, %c0_90], %116 {strides = array<i32>} : memref<4x16x8xbf16, #tpu.memory_space<vmem>>, vector<1x16x8xbf16>,
    %117 = arith.truncf %105 : vector<16x8xf32> to vector<16x8xbf16>
    %c2_91 = arith.constant 2 : index
    %c0_92 = arith.constant 0 : index
    %c0_93 = arith.constant 0 : index
    %118 = vector.load %arg11[%c2_91, %c0_92, %c0_93] : memref<4x16x8xbf16, #tpu.memory_space<vmem>>, vector<1x16x8xbf16>
    %119 = vector.shape_cast %118 : vector<1x16x8xbf16> to vector<16x8xbf16>
    %120 = vector.shape_cast %117 : vector<16x8xbf16> to vector<1x16x8xbf16>
    tpu.vector_store %arg11[%c2_91, %c0_92, %c0_93], %120 {strides = array<i32>} : memref<4x16x8xbf16, #tpu.memory_space<vmem>>, vector<1x16x8xbf16>,
    %121 = arith.truncf %112 : vector<16x8xf32> to vector<16x8xbf16>
    %c2_94 = arith.constant 2 : index
    %c0_95 = arith.constant 0 : index
    %c0_96 = arith.constant 0 : index
    %122 = vector.load %arg12[%c2_94, %c0_95, %c0_96] : memref<4x16x8xbf16, #tpu.memory_space<vmem>>, vector<1x16x8xbf16>
    %123 = vector.shape_cast %122 : vector<1x16x8xbf16> to vector<16x8xbf16>
    %124 = vector.shape_cast %121 : vector<16x8xbf16> to vector<1x16x8xbf16>
    tpu.vector_store %arg12[%c2_94, %c0_95, %c0_96], %124 {strides = array<i32>} : memref<4x16x8xbf16, #tpu.memory_space<vmem>>, vector<1x16x8xbf16>,
    %c3 = arith.constant 3 : index
    %c0_97 = arith.constant 0 : index
    %c0_98 = arith.constant 0 : index
    %125 = vector.load %arg4[%c3, %c0_97, %c0_98] : memref<4x32x8xbf16, #tpu.memory_space<vmem>>, vector<1x32x8xbf16>
    %126 = vector.shape_cast %125 : vector<1x32x8xbf16> to vector<32x8xbf16>
    %cst_99 = arith.constant dense<0.000000e+00> : vector<16x8xf32>
    %127 = tpu.matmul %25, %126, %cst_99 {dimension_numbers = #tpu.dot_dimension_numbers<[1], [0], [0], [1], [0, 0, 1, 1], [], []>} : vector<16x32xbf16>, vector<32x8xbf16>, vector<16x8xf32> -> vector<16x8xf32>
    %c3_100 = arith.constant 3 : index
    %c0_101 = arith.constant 0 : index
    %c0_102 = arith.constant 0 : index
    %128 = vector.load %arg7[%c3_100, %c0_101, %c0_102] : memref<4x1x8xf32, #tpu.memory_space<vmem>>, vector<1x1x8xf32>
    %129 = vector.shape_cast %128 : vector<1x1x8xf32> to vector<1x8xf32>
    %130 = vector.broadcast %129 : vector<1x8xf32> to vector<16x8xf32>
    %131 = arith.addf %127, %130 : vector<16x8xf32>
    %c3_103 = arith.constant 3 : index
    %c0_104 = arith.constant 0 : index
    %c0_105 = arith.constant 0 : index
    %132 = vector.load %arg5[%c3_103, %c0_104, %c0_105] : memref<4x32x8xbf16, #tpu.memory_space<vmem>>, vector<1x32x8xbf16>
    %133 = vector.shape_cast %132 : vector<1x32x8xbf16> to vector<32x8xbf16>
    %cst_106 = arith.constant dense<0.000000e+00> : vector<16x8xf32>
    %134 = tpu.matmul %25, %133, %cst_106 {dimension_numbers = #tpu.dot_dimension_numbers<[1], [0], [0], [1], [0, 0, 1, 1], [], []>} : vector<16x32xbf16>, vector<32x8xbf16>, vector<16x8xf32> -> vector<16x8xf32>
    %c3_107 = arith.constant 3 : index
    %c0_108 = arith.constant 0 : index
    %c0_109 = arith.constant 0 : index
    %135 = vector.load %arg8[%c3_107, %c0_108, %c0_109] : memref<4x1x8xf32, #tpu.memory_space<vmem>>, vector<1x1x8xf32>
    %136 = vector.shape_cast %135 : vector<1x1x8xf32> to vector<1x8xf32>
    %137 = vector.broadcast %136 : vector<1x8xf32> to vector<16x8xf32>
    %138 = arith.addf %134, %137 : vector<16x8xf32>
    %c3_110 = arith.constant 3 : index
    %c0_111 = arith.constant 0 : index
    %c0_112 = arith.constant 0 : index
    %139 = vector.load %arg6[%c3_110, %c0_111, %c0_112] : memref<4x32x8xbf16, #tpu.memory_space<vmem>>, vector<1x32x8xbf16>
    %140 = vector.shape_cast %139 : vector<1x32x8xbf16> to vector<32x8xbf16>
    %cst_113 = arith.constant dense<0.000000e+00> : vector<16x8xf32>
    %141 = tpu.matmul %25, %140, %cst_113 {dimension_numbers = #tpu.dot_dimension_numbers<[1], [0], [0], [1], [0, 0, 1, 1], [], []>} : vector<16x32xbf16>, vector<32x8xbf16>, vector<16x8xf32> -> vector<16x8xf32>
    %c3_114 = arith.constant 3 : index
    %c0_115 = arith.constant 0 : index
    %c0_116 = arith.constant 0 : index
    %142 = vector.load %arg9[%c3_114, %c0_115, %c0_116] : memref<4x1x8xf32, #tpu.memory_space<vmem>>, vector<1x1x8xf32>
    %143 = vector.shape_cast %142 : vector<1x1x8xf32> to vector<1x8xf32>
    %144 = vector.broadcast %143 : vector<1x8xf32> to vector<16x8xf32>
    %145 = arith.addf %141, %144 : vector<16x8xf32>
    %146 = arith.truncf %131 : vector<16x8xf32> to vector<16x8xbf16>
    %c3_117 = arith.constant 3 : index
    %c0_118 = arith.constant 0 : index
    %c0_119 = arith.constant 0 : index
    %147 = vector.load %arg10[%c3_117, %c0_118, %c0_119] : memref<4x16x8xbf16, #tpu.memory_space<vmem>>, vector<1x16x8xbf16>
    %148 = vector.shape_cast %147 : vector<1x16x8xbf16> to vector<16x8xbf16>
    %149 = vector.shape_cast %146 : vector<16x8xbf16> to vector<1x16x8xbf16>
    tpu.vector_store %arg10[%c3_117, %c0_118, %c0_119], %149 {strides = array<i32>} : memref<4x16x8xbf16, #tpu.memory_space<vmem>>, vector<1x16x8xbf16>,
    %150 = arith.truncf %138 : vector<16x8xf32> to vector<16x8xbf16>
    %c3_120 = arith.constant 3 : index
    %c0_121 = arith.constant 0 : index
    %c0_122 = arith.constant 0 : index
    %151 = vector.load %arg11[%c3_120, %c0_121, %c0_122] : memref<4x16x8xbf16, #tpu.memory_space<vmem>>, vector<1x16x8xbf16>
    %152 = vector.shape_cast %151 : vector<1x16x8xbf16> to vector<16x8xbf16>
    %153 = vector.shape_cast %150 : vector<16x8xbf16> to vector<1x16x8xbf16>
    tpu.vector_store %arg11[%c3_120, %c0_121, %c0_122], %153 {strides = array<i32>} : memref<4x16x8xbf16, #tpu.memory_space<vmem>>, vector<1x16x8xbf16>,
    %154 = arith.truncf %145 : vector<16x8xf32> to vector<16x8xbf16>
    %c3_123 = arith.constant 3 : index
    %c0_124 = arith.constant 0 : index
    %c0_125 = arith.constant 0 : index
    %155 = vector.load %arg12[%c3_123, %c0_124, %c0_125] : memref<4x16x8xbf16, #tpu.memory_space<vmem>>, vector<1x16x8xbf16>
    %156 = vector.shape_cast %155 : vector<1x16x8xbf16> to vector<16x8xbf16>
    %157 = vector.shape_cast %154 : vector<16x8xbf16> to vector<1x16x8xbf16>
    tpu.vector_store %arg12[%c3_123, %c0_124, %c0_125], %157 {strides = array<i32>} : memref<4x16x8xbf16, #tpu.memory_space<vmem>>, vector<1x16x8xbf16>,
    return
  }
  func.func @transform_0(%arg0: i32) -> (i32, i32) {
    %c0_i32 = arith.constant 0 : i32
    %c0_i32_0 = arith.constant 0 : i32
    return %arg0, %c0_i32 : i32, i32
  }
  func.func @transform_1(%arg0: i32) -> (i32, i32) {
    %c0_i32 = arith.constant 0 : i32
    %c0_i32_0 = arith.constant 0 : i32
    %c0_i32_1 = arith.constant 0 : i32
    return %c0_i32, %c0_i32_0 : i32, i32
  }
  func.func @transform_2(%arg0: i32) -> (i32, i32) {
    %c0_i32 = arith.constant 0 : i32
    %c0_i32_0 = arith.constant 0 : i32
    %c0_i32_1 = arith.constant 0 : i32
    return %c0_i32, %c0_i32_0 : i32, i32
  }
  func.func @transform_3(%arg0: i32) -> (i32, i32, i32) {
    %c0_i32 = arith.constant 0 : i32
    %c0_i32_0 = arith.constant 0 : i32
    %c0_i32_1 = arith.constant 0 : i32
    %c0_i32_2 = arith.constant 0 : i32
    return %c0_i32, %c0_i32_0, %c0_i32_1 : i32, i32, i32
  }
  func.func @transform_4(%arg0: i32) -> (i32, i32, i32) {
    %c0_i32 = arith.constant 0 : i32
    %c0_i32_0 = arith.constant 0 : i32
    %c0_i32_1 = arith.constant 0 : i32
    %c0_i32_2 = arith.constant 0 : i32
    return %c0_i32, %c0_i32_0, %c0_i32_1 : i32, i32, i32
  }
  func.func @transform_5(%arg0: i32) -> (i32, i32, i32) {
    %c0_i32 = arith.constant 0 : i32
    %c0_i32_0 = arith.constant 0 : i32
    %c0_i32_1 = arith.constant 0 : i32
    %c0_i32_2 = arith.constant 0 : i32
    return %c0_i32, %c0_i32_0, %c0_i32_1 : i32, i32, i32
  }
  func.func @transform_6(%arg0: i32) -> (i32, i32, i32) {
    %c0_i32 = arith.constant 0 : i32
    %c0_i32_0 = arith.constant 0 : i32
    %c0_i32_1 = arith.constant 0 : i32
    %c0_i32_2 = arith.constant 0 : i32
    return %c0_i32, %c0_i32_0, %c0_i32_1 : i32, i32, i32
  }
  func.func @transform_7(%arg0: i32) -> (i32, i32, i32) {
    %c0_i32 = arith.constant 0 : i32
    %c0_i32_0 = arith.constant 0 : i32
    %c0_i32_1 = arith.constant 0 : i32
    %c0_i32_2 = arith.constant 0 : i32
    return %c0_i32, %c0_i32_0, %c0_i32_1 : i32, i32, i32
  }
  func.func @transform_8(%arg0: i32) -> (i32, i32, i32) {
    %c0_i32 = arith.constant 0 : i32
    %c0_i32_0 = arith.constant 0 : i32
    %c0_i32_1 = arith.constant 0 : i32
    %c0_i32_2 = arith.constant 0 : i32
    return %c0_i32, %c0_i32_0, %c0_i32_1 : i32, i32, i32
  }
  func.func @transform_9(%arg0: i32) -> (i32, i32, i32) {
    %c0_i32 = arith.constant 0 : i32
    %c0_i32_0 = arith.constant 0 : i32
    %c0_i32_1 = arith.constant 0 : i32
    return %c0_i32, %arg0, %c0_i32_0 : i32, i32, i32
  }
  func.func @transform_10(%arg0: i32) -> (i32, i32, i32) {
    %c0_i32 = arith.constant 0 : i32
    %c0_i32_0 = arith.constant 0 : i32
    %c0_i32_1 = arith.constant 0 : i32
    return %c0_i32, %arg0, %c0_i32_0 : i32, i32, i32
  }
  func.func @transform_11(%arg0: i32) -> (i32, i32, i32) {
    %c0_i32 = arith.constant 0 : i32
    %c0_i32_0 = arith.constant 0 : i32
    %c0_i32_1 = arith.constant 0 : i32
    return %c0_i32, %arg0, %c0_i32_0 : i32, i32, i32
  }
}

module attributes {stable_mosaic.version = 11 : i64} {
  func.func @post_attn_mlp_kernel(%arg0: i32, %arg1: memref<16x32xf32, #tpu.memory_space<vmem>>, %arg2: memref<4x16x8xbf16, #tpu.memory_space<vmem>>, %arg3: memref<4x8x32xbf16, #tpu.memory_space<vmem>>, %arg4: memref<1x32xf32, #tpu.memory_space<vmem>>, %arg5: memref<1x32xf32, #tpu.memory_space<vmem>>, %arg6: memref<1x32xf32, #tpu.memory_space<vmem>>, %arg7: memref<32x64xbf16, #tpu.memory_space<vmem>>, %arg8: memref<1x64xf32, #tpu.memory_space<vmem>>, %arg9: memref<64x32xbf16, #tpu.memory_space<vmem>>, %arg10: memref<1x32xf32, #tpu.memory_space<vmem>>, %arg11: memref<16x32xf32, #tpu.memory_space<vmem>>) attributes {dimension_semantics = [#tpu.dimension_semantics<parallel>], iteration_bounds = array<i64: 1>, scalar_prefetch = 0 : i64, scratch_operands = 0 : i64, tpu.core_type = #tpu.core_type<tc>, window_params = [{transform_indices = @transform_0, window_bounds = array<i64: 16, 32>}, {transform_indices = @transform_1, window_bounds = array<i64: 4, 16, 8>}, {pipeline_mode = #tpu.pipeline_mode<synchronous>, transform_indices = @transform_2, window_bounds = array<i64: 4, 8, 32>}, {pipeline_mode = #tpu.pipeline_mode<synchronous>, transform_indices = @transform_3, window_bounds = array<i64: 1, 32>}, {pipeline_mode = #tpu.pipeline_mode<synchronous>, transform_indices = @transform_4, window_bounds = array<i64: 1, 32>}, {pipeline_mode = #tpu.pipeline_mode<synchronous>, transform_indices = @transform_5, window_bounds = array<i64: 1, 32>}, {pipeline_mode = #tpu.pipeline_mode<synchronous>, transform_indices = @transform_6, window_bounds = array<i64: 32, 64>}, {pipeline_mode = #tpu.pipeline_mode<synchronous>, transform_indices = @transform_7, window_bounds = array<i64: 1, 64>}, {pipeline_mode = #tpu.pipeline_mode<synchronous>, transform_indices = @transform_8, window_bounds = array<i64: 64, 32>}, {pipeline_mode = #tpu.pipeline_mode<synchronous>, transform_indices = @transform_9, window_bounds = array<i64: 1, 32>}, {transform_indices = @transform_10, window_bounds = array<i64: 16, 32>}]} {
    %c0 = arith.constant 0 : index
    %c0_0 = arith.constant 0 : index
    %c0_1 = arith.constant 0 : index
    %0 = vector.load %arg2[%c0, %c0_0, %c0_1] : memref<4x16x8xbf16, #tpu.memory_space<vmem>>, vector<1x16x8xbf16>
    %1 = vector.shape_cast %0 : vector<1x16x8xbf16> to vector<16x8xbf16>
    %c0_2 = arith.constant 0 : index
    %c0_3 = arith.constant 0 : index
    %c0_4 = arith.constant 0 : index
    %2 = vector.load %arg3[%c0_2, %c0_3, %c0_4] : memref<4x8x32xbf16, #tpu.memory_space<vmem>>, vector<1x8x32xbf16>
    %3 = vector.shape_cast %2 : vector<1x8x32xbf16> to vector<8x32xbf16>
    %cst = arith.constant dense<0.000000e+00> : vector<16x32xf32>
    %4 = tpu.matmul %1, %3, %cst {dimension_numbers = #tpu.dot_dimension_numbers<[1], [0], [0], [1], [0, 0, 1, 1], [], []>} : vector<16x8xbf16>, vector<8x32xbf16>, vector<16x32xf32> -> vector<16x32xf32>
    %c1 = arith.constant 1 : index
    %c0_5 = arith.constant 0 : index
    %c0_6 = arith.constant 0 : index
    %5 = vector.load %arg2[%c1, %c0_5, %c0_6] : memref<4x16x8xbf16, #tpu.memory_space<vmem>>, vector<1x16x8xbf16>
    %6 = vector.shape_cast %5 : vector<1x16x8xbf16> to vector<16x8xbf16>
    %c1_7 = arith.constant 1 : index
    %c0_8 = arith.constant 0 : index
    %c0_9 = arith.constant 0 : index
    %7 = vector.load %arg3[%c1_7, %c0_8, %c0_9] : memref<4x8x32xbf16, #tpu.memory_space<vmem>>, vector<1x8x32xbf16>
    %8 = vector.shape_cast %7 : vector<1x8x32xbf16> to vector<8x32xbf16>
    %cst_10 = arith.constant dense<0.000000e+00> : vector<16x32xf32>
    %9 = tpu.matmul %6, %8, %cst_10 {dimension_numbers = #tpu.dot_dimension_numbers<[1], [0], [0], [1], [0, 0, 1, 1], [], []>} : vector<16x8xbf16>, vector<8x32xbf16>, vector<16x32xf32> -> vector<16x32xf32>
    %10 = arith.addf %4, %9 : vector<16x32xf32>
    %c2 = arith.constant 2 : index
    %c0_11 = arith.constant 0 : index
    %c0_12 = arith.constant 0 : index
    %11 = vector.load %arg2[%c2, %c0_11, %c0_12] : memref<4x16x8xbf16, #tpu.memory_space<vmem>>, vector<1x16x8xbf16>
    %12 = vector.shape_cast %11 : vector<1x16x8xbf16> to vector<16x8xbf16>
    %c2_13 = arith.constant 2 : index
    %c0_14 = arith.constant 0 : index
    %c0_15 = arith.constant 0 : index
    %13 = vector.load %arg3[%c2_13, %c0_14, %c0_15] : memref<4x8x32xbf16, #tpu.memory_space<vmem>>, vector<1x8x32xbf16>
    %14 = vector.shape_cast %13 : vector<1x8x32xbf16> to vector<8x32xbf16>
    %cst_16 = arith.constant dense<0.000000e+00> : vector<16x32xf32>
    %15 = tpu.matmul %12, %14, %cst_16 {dimension_numbers = #tpu.dot_dimension_numbers<[1], [0], [0], [1], [0, 0, 1, 1], [], []>} : vector<16x8xbf16>, vector<8x32xbf16>, vector<16x32xf32> -> vector<16x32xf32>
    %16 = arith.addf %10, %15 : vector<16x32xf32>
    %c3 = arith.constant 3 : index
    %c0_17 = arith.constant 0 : index
    %c0_18 = arith.constant 0 : index
    %17 = vector.load %arg2[%c3, %c0_17, %c0_18] : memref<4x16x8xbf16, #tpu.memory_space<vmem>>, vector<1x16x8xbf16>
    %18 = vector.shape_cast %17 : vector<1x16x8xbf16> to vector<16x8xbf16>
    %c3_19 = arith.constant 3 : index
    %c0_20 = arith.constant 0 : index
    %c0_21 = arith.constant 0 : index
    %19 = vector.load %arg3[%c3_19, %c0_20, %c0_21] : memref<4x8x32xbf16, #tpu.memory_space<vmem>>, vector<1x8x32xbf16>
    %20 = vector.shape_cast %19 : vector<1x8x32xbf16> to vector<8x32xbf16>
    %cst_22 = arith.constant dense<0.000000e+00> : vector<16x32xf32>
    %21 = tpu.matmul %18, %20, %cst_22 {dimension_numbers = #tpu.dot_dimension_numbers<[1], [0], [0], [1], [0, 0, 1, 1], [], []>} : vector<16x8xbf16>, vector<8x32xbf16>, vector<16x32xf32> -> vector<16x32xf32>
    %22 = arith.addf %16, %21 : vector<16x32xf32>
    %c0_23 = arith.constant 0 : index
    %c0_24 = arith.constant 0 : index
    %23 = vector.load %arg1[%c0_23, %c0_24] : memref<16x32xf32, #tpu.memory_space<vmem>>, vector<16x32xf32>
    %24 = arith.addf %23, %22 : vector<16x32xf32>
    %c0_25 = arith.constant 0 : index
    %c0_26 = arith.constant 0 : index
    %25 = vector.load %arg4[%c0_25, %c0_26] : memref<1x32xf32, #tpu.memory_space<vmem>>, vector<1x32xf32>
    %26 = vector.broadcast %25 : vector<1x32xf32> to vector<16x32xf32>
    %27 = arith.addf %24, %26 : vector<16x32xf32>
    %c0_27 = arith.constant 0 : index
    %c0_28 = arith.constant 0 : index
    %28 = vector.load %arg5[%c0_27, %c0_28] : memref<1x32xf32, #tpu.memory_space<vmem>>, vector<1x32xf32>
    %c0_29 = arith.constant 0 : index
    %c0_30 = arith.constant 0 : index
    %29 = vector.load %arg6[%c0_29, %c0_30] : memref<1x32xf32, #tpu.memory_space<vmem>>, vector<1x32xf32>
    %cst_31 = arith.constant dense<0.000000e+00> : vector<16xf32>
    %30 = vector.multi_reduction <add>, %27, %cst_31 [1] : vector<16x32xf32> to vector<16xf32>
    %31 = vector.shape_cast %30 : vector<16xf32> to vector<16x1xf32>
    %cst_32 = arith.constant 3.200000e+01 : f32
    %32 = vector.broadcast %cst_32 : f32 to vector<16x1xf32>
    %33 = arith.divf %31, %32 : vector<16x1xf32>
    %34 = vector.broadcast %33 : vector<16x1xf32> to vector<16x32xf32>
    %35 = arith.subf %27, %34 : vector<16x32xf32>
    %36 = arith.mulf %35, %35 : vector<16x32xf32>
    %cst_33 = arith.constant dense<0.000000e+00> : vector<16xf32>
    %37 = vector.multi_reduction <add>, %36, %cst_33 [1] : vector<16x32xf32> to vector<16xf32>
    %38 = vector.shape_cast %37 : vector<16xf32> to vector<16x1xf32>
    %cst_34 = arith.constant 3.200000e+01 : f32
    %39 = vector.broadcast %cst_34 : f32 to vector<16x1xf32>
    %40 = arith.divf %38, %39 : vector<16x1xf32>
    %41 = vector.broadcast %33 : vector<16x1xf32> to vector<16x32xf32>
    %42 = arith.subf %27, %41 : vector<16x32xf32>
    %cst_35 = arith.constant 9.99999974E-6 : f32
    %43 = vector.broadcast %cst_35 : f32 to vector<16x1xf32>
    %44 = arith.addf %40, %43 : vector<16x1xf32>
    %45 = math.rsqrt %44 : vector<16x1xf32>
    %46 = vector.broadcast %45 : vector<16x1xf32> to vector<16x32xf32>
    %47 = arith.mulf %42, %46 : vector<16x32xf32>
    %48 = vector.broadcast %28 : vector<1x32xf32> to vector<16x32xf32>
    %49 = arith.mulf %47, %48 : vector<16x32xf32>
    %50 = vector.broadcast %29 : vector<1x32xf32> to vector<16x32xf32>
    %51 = arith.addf %49, %50 : vector<16x32xf32>
    %52 = arith.truncf %51 : vector<16x32xf32> to vector<16x32xbf16>
    %c0_36 = arith.constant 0 : index
    %c0_37 = arith.constant 0 : index
    %53 = vector.load %arg7[%c0_36, %c0_37] : memref<32x64xbf16, #tpu.memory_space<vmem>>, vector<32x64xbf16>
    %cst_38 = arith.constant dense<0.000000e+00> : vector<16x64xf32>
    %54 = tpu.matmul %52, %53, %cst_38 {dimension_numbers = #tpu.dot_dimension_numbers<[1], [0], [0], [1], [0, 0, 1, 1], [], []>} : vector<16x32xbf16>, vector<32x64xbf16>, vector<16x64xf32> -> vector<16x64xf32>
    %c0_39 = arith.constant 0 : index
    %c0_40 = arith.constant 0 : index
    %55 = vector.load %arg8[%c0_39, %c0_40] : memref<1x64xf32, #tpu.memory_space<vmem>>, vector<1x64xf32>
    %56 = vector.broadcast %55 : vector<1x64xf32> to vector<16x64xf32>
    %57 = arith.addf %54, %56 : vector<16x64xf32>
    %cst_41 = arith.constant 5.000000e-01 : f32
    %58 = vector.broadcast %cst_41 : f32 to vector<16x64xf32>
    %59 = arith.mulf %58, %57 : vector<16x64xf32>
    %cst_42 = arith.constant 0.707106769 : f32
    %60 = vector.broadcast %cst_42 : f32 to vector<16x64xf32>
    %61 = arith.mulf %57, %60 : vector<16x64xf32>
    %62 = math.absf %61 : vector<16x64xf32>
    %cst_43 = arith.constant 0.327591091 : f32
    %63 = vector.broadcast %cst_43 : f32 to vector<16x64xf32>
    %64 = arith.mulf %63, %62 : vector<16x64xf32>
    %cst_44 = arith.constant 1.000000e+00 : f32
    %65 = vector.broadcast %cst_44 : f32 to vector<16x64xf32>
    %66 = arith.addf %65, %64 : vector<16x64xf32>
    %cst_45 = arith.constant 1.000000e+00 : f32
    %67 = vector.broadcast %cst_45 : f32 to vector<16x64xf32>
    %68 = arith.divf %67, %66 : vector<16x64xf32>
    %cst_46 = arith.constant 1.06140542 : f32
    %69 = vector.broadcast %cst_46 : f32 to vector<16x64xf32>
    %70 = arith.mulf %69, %68 : vector<16x64xf32>
    %cst_47 = arith.constant -1.45315206 : f32
    %71 = vector.broadcast %cst_47 : f32 to vector<16x64xf32>
    %72 = arith.addf %70, %71 : vector<16x64xf32>
    %73 = arith.mulf %72, %68 : vector<16x64xf32>
    %cst_48 = arith.constant 1.42141378 : f32
    %74 = vector.broadcast %cst_48 : f32 to vector<16x64xf32>
    %75 = arith.addf %73, %74 : vector<16x64xf32>
    %76 = arith.mulf %75, %68 : vector<16x64xf32>
    %cst_49 = arith.constant -0.284496725 : f32
    %77 = vector.broadcast %cst_49 : f32 to vector<16x64xf32>
    %78 = arith.addf %76, %77 : vector<16x64xf32>
    %79 = arith.mulf %78, %68 : vector<16x64xf32>
    %cst_50 = arith.constant 0.254829586 : f32
    %80 = vector.broadcast %cst_50 : f32 to vector<16x64xf32>
    %81 = arith.addf %79, %80 : vector<16x64xf32>
    %82 = arith.mulf %81, %68 : vector<16x64xf32>
    %cst_51 = arith.constant 0.000000e+00 : f32
    %83 = vector.broadcast %cst_51 : f32 to vector<16x64xf32>
    %84 = arith.subf %83, %62 : vector<16x64xf32>
    %85 = arith.mulf %84, %62 : vector<16x64xf32>
    %86 = math.exp %85 : vector<16x64xf32>
    %87 = arith.mulf %82, %86 : vector<16x64xf32>
    %cst_52 = arith.constant 1.000000e+00 : f32
    %88 = vector.broadcast %cst_52 : f32 to vector<16x64xf32>
    %89 = arith.subf %88, %87 : vector<16x64xf32>
    %cst_53 = arith.constant 0.000000e+00 : f32
    %90 = vector.broadcast %cst_53 : f32 to vector<16x64xf32>
    %91 = arith.cmpf oge, %61, %90 : vector<16x64xf32>
    %cst_54 = arith.constant 0.000000e+00 : f32
    %92 = vector.broadcast %cst_54 : f32 to vector<16x64xf32>
    %93 = arith.subf %92, %89 : vector<16x64xf32>
    %94 = arith.select %91, %89, %93 : vector<16x64xi1>, vector<16x64xf32>
    %cst_55 = arith.constant 1.000000e+00 : f32
    %95 = vector.broadcast %cst_55 : f32 to vector<16x64xf32>
    %96 = arith.addf %95, %94 : vector<16x64xf32>
    %97 = arith.mulf %59, %96 : vector<16x64xf32>
    %98 = arith.truncf %97 : vector<16x64xf32> to vector<16x64xbf16>
    %c0_56 = arith.constant 0 : index
    %c0_57 = arith.constant 0 : index
    %99 = vector.load %arg9[%c0_56, %c0_57] : memref<64x32xbf16, #tpu.memory_space<vmem>>, vector<64x32xbf16>
    %cst_58 = arith.constant dense<0.000000e+00> : vector<16x32xf32>
    %100 = tpu.matmul %98, %99, %cst_58 {dimension_numbers = #tpu.dot_dimension_numbers<[1], [0], [0], [1], [0, 0, 1, 1], [], []>} : vector<16x64xbf16>, vector<64x32xbf16>, vector<16x32xf32> -> vector<16x32xf32>
    %c0_59 = arith.constant 0 : index
    %c0_60 = arith.constant 0 : index
    %101 = vector.load %arg10[%c0_59, %c0_60] : memref<1x32xf32, #tpu.memory_space<vmem>>, vector<1x32xf32>
    %102 = vector.broadcast %101 : vector<1x32xf32> to vector<16x32xf32>
    %103 = arith.addf %100, %102 : vector<16x32xf32>
    %104 = arith.addf %27, %103 : vector<16x32xf32>
    %c0_61 = arith.constant 0 : index
    %c0_62 = arith.constant 0 : index
    %105 = vector.load %arg11[%c0_61, %c0_62] : memref<16x32xf32, #tpu.memory_space<vmem>>, vector<16x32xf32>
    tpu.vector_store %arg11[%c0_61, %c0_62], %104 {strides = array<i32>} : memref<16x32xf32, #tpu.memory_space<vmem>>, vector<16x32xf32>,
    return
  }
  func.func @transform_0(%arg0: i32) -> (i32, i32) {
    %c0_i32 = arith.constant 0 : i32
    %c0_i32_0 = arith.constant 0 : i32
    return %arg0, %c0_i32 : i32, i32
  }
  func.func @transform_1(%arg0: i32) -> (i32, i32, i32) {
    %c0_i32 = arith.constant 0 : i32
    %c0_i32_0 = arith.constant 0 : i32
    %c0_i32_1 = arith.constant 0 : i32
    return %c0_i32, %arg0, %c0_i32_0 : i32, i32, i32
  }
  func.func @transform_2(%arg0: i32) -> (i32, i32, i32) {
    %c0_i32 = arith.constant 0 : i32
    %c0_i32_0 = arith.constant 0 : i32
    %c0_i32_1 = arith.constant 0 : i32
    %c0_i32_2 = arith.constant 0 : i32
    return %c0_i32, %c0_i32_0, %c0_i32_1 : i32, i32, i32
  }
  func.func @transform_3(%arg0: i32) -> (i32, i32) {
    %c0_i32 = arith.constant 0 : i32
    %c0_i32_0 = arith.constant 0 : i32
    %c0_i32_1 = arith.constant 0 : i32
    return %c0_i32, %c0_i32_0 : i32, i32
  }
  func.func @transform_4(%arg0: i32) -> (i32, i32) {
    %c0_i32 = arith.constant 0 : i32
    %c0_i32_0 = arith.constant 0 : i32
    %c0_i32_1 = arith.constant 0 : i32
    return %c0_i32, %c0_i32_0 : i32, i32
  }
  func.func @transform_5(%arg0: i32) -> (i32, i32) {
    %c0_i32 = arith.constant 0 : i32
    %c0_i32_0 = arith.constant 0 : i32
    %c0_i32_1 = arith.constant 0 : i32
    return %c0_i32, %c0_i32_0 : i32, i32
  }
  func.func @transform_6(%arg0: i32) -> (i32, i32) {
    %c0_i32 = arith.constant 0 : i32
    %c0_i32_0 = arith.constant 0 : i32
    %c0_i32_1 = arith.constant 0 : i32
    return %c0_i32, %c0_i32_0 : i32, i32
  }
  func.func @transform_7(%arg0: i32) -> (i32, i32) {
    %c0_i32 = arith.constant 0 : i32
    %c0_i32_0 = arith.constant 0 : i32
    %c0_i32_1 = arith.constant 0 : i32
    return %c0_i32, %c0_i32_0 : i32, i32
  }
  func.func @transform_8(%arg0: i32) -> (i32, i32) {
    %c0_i32 = arith.constant 0 : i32
    %c0_i32_0 = arith.constant 0 : i32
    %c0_i32_1 = arith.constant 0 : i32
    return %c0_i32, %c0_i32_0 : i32, i32
  }
  func.func @transform_9(%arg0: i32) -> (i32, i32) {
    %c0_i32 = arith.constant 0 : i32
    %c0_i32_0 = arith.constant 0 : i32
    %c0_i32_1 = arith.constant 0 : i32
    return %c0_i32, %c0_i32_0 : i32, i32
  }
  func.func @transform_10(%arg0: i32) -> (i32, i32) {
    %c0_i32 = arith.constant 0 : i32
    %c0_i32_0 = arith.constant 0 : i32
    return %arg0, %c0_i32 : i32, i32
  }
}

module attributes {stable_mosaic.version = 11 : i64} {
  func.func @head_kernel(%arg0: i32, %arg1: memref<2x32xf32, #tpu.memory_space<vmem>>, %arg2: memref<1x32xf32, #tpu.memory_space<vmem>>, %arg3: memref<1x32xf32, #tpu.memory_space<vmem>>, %arg4: memref<32x2xbf16, #tpu.memory_space<vmem>>, %arg5: memref<1x2xf32, #tpu.memory_space<vmem>>, %arg6: memref<2x2xf32, #tpu.memory_space<vmem>>) attributes {dimension_semantics = [#tpu.dimension_semantics<arbitrary>], iteration_bounds = array<i64: 1>, scalar_prefetch = 0 : i64, scratch_operands = 0 : i64, tpu.core_type = #tpu.core_type<tc>, window_params = [{pipeline_mode = #tpu.pipeline_mode<synchronous>, transform_indices = @transform_0, window_bounds = array<i64: 2, 32>}, {pipeline_mode = #tpu.pipeline_mode<synchronous>, transform_indices = @transform_1, window_bounds = array<i64: 1, 32>}, {pipeline_mode = #tpu.pipeline_mode<synchronous>, transform_indices = @transform_2, window_bounds = array<i64: 1, 32>}, {pipeline_mode = #tpu.pipeline_mode<synchronous>, transform_indices = @transform_3, window_bounds = array<i64: 32, 2>}, {pipeline_mode = #tpu.pipeline_mode<synchronous>, transform_indices = @transform_4, window_bounds = array<i64: 1, 2>}, {pipeline_mode = #tpu.pipeline_mode<synchronous>, transform_indices = @transform_5, window_bounds = array<i64: 2, 2>}]} {
    %c0 = arith.constant 0 : index
    %c0_0 = arith.constant 0 : index
    %0 = vector.load %arg1[%c0, %c0_0] : memref<2x32xf32, #tpu.memory_space<vmem>>, vector<2x32xf32>
    %c0_1 = arith.constant 0 : index
    %c0_2 = arith.constant 0 : index
    %1 = vector.load %arg2[%c0_1, %c0_2] : memref<1x32xf32, #tpu.memory_space<vmem>>, vector<1x32xf32>
    %c0_3 = arith.constant 0 : index
    %c0_4 = arith.constant 0 : index
    %2 = vector.load %arg3[%c0_3, %c0_4] : memref<1x32xf32, #tpu.memory_space<vmem>>, vector<1x32xf32>
    %cst = arith.constant dense<0.000000e+00> : vector<2xf32>
    %3 = vector.multi_reduction <add>, %0, %cst [1] : vector<2x32xf32> to vector<2xf32>
    %4 = vector.shape_cast %3 : vector<2xf32> to vector<2x1xf32>
    %cst_5 = arith.constant 3.200000e+01 : f32
    %5 = vector.broadcast %cst_5 : f32 to vector<2x1xf32>
    %6 = arith.divf %4, %5 : vector<2x1xf32>
    %7 = vector.broadcast %6 : vector<2x1xf32> to vector<2x32xf32>
    %8 = arith.subf %0, %7 : vector<2x32xf32>
    %9 = arith.mulf %8, %8 : vector<2x32xf32>
    %cst_6 = arith.constant dense<0.000000e+00> : vector<2xf32>
    %10 = vector.multi_reduction <add>, %9, %cst_6 [1] : vector<2x32xf32> to vector<2xf32>
    %11 = vector.shape_cast %10 : vector<2xf32> to vector<2x1xf32>
    %cst_7 = arith.constant 3.200000e+01 : f32
    %12 = vector.broadcast %cst_7 : f32 to vector<2x1xf32>
    %13 = arith.divf %11, %12 : vector<2x1xf32>
    %14 = vector.broadcast %6 : vector<2x1xf32> to vector<2x32xf32>
    %15 = arith.subf %0, %14 : vector<2x32xf32>
    %cst_8 = arith.constant 9.99999974E-6 : f32
    %16 = vector.broadcast %cst_8 : f32 to vector<2x1xf32>
    %17 = arith.addf %13, %16 : vector<2x1xf32>
    %18 = math.rsqrt %17 : vector<2x1xf32>
    %19 = vector.broadcast %18 : vector<2x1xf32> to vector<2x32xf32>
    %20 = arith.mulf %15, %19 : vector<2x32xf32>
    %21 = vector.broadcast %1 : vector<1x32xf32> to vector<2x32xf32>
    %22 = arith.mulf %20, %21 : vector<2x32xf32>
    %23 = vector.broadcast %2 : vector<1x32xf32> to vector<2x32xf32>
    %24 = arith.addf %22, %23 : vector<2x32xf32>
    %25 = arith.truncf %24 : vector<2x32xf32> to vector<2x32xbf16>
    %c0_9 = arith.constant 0 : index
    %c0_10 = arith.constant 0 : index
    %26 = vector.load %arg4[%c0_9, %c0_10] : memref<32x2xbf16, #tpu.memory_space<vmem>>, vector<32x2xbf16>
    %cst_11 = arith.constant dense<0.000000e+00> : vector<2x2xf32>
    %27 = tpu.matmul %25, %26, %cst_11 {dimension_numbers = #tpu.dot_dimension_numbers<[1], [0], [0], [1], [0, 0, 1, 1], [], []>} : vector<2x32xbf16>, vector<32x2xbf16>, vector<2x2xf32> -> vector<2x2xf32>
    %c0_12 = arith.constant 0 : index
    %c0_13 = arith.constant 0 : index
    %28 = vector.load %arg5[%c0_12, %c0_13] : memref<1x2xf32, #tpu.memory_space<vmem>>, vector<1x2xf32>
    %29 = vector.broadcast %28 : vector<1x2xf32> to vector<2x2xf32>
    %30 = arith.addf %27, %29 : vector<2x2xf32>
    %c0_14 = arith.constant 0 : index
    %c0_15 = arith.constant 0 : index
    %31 = vector.load %arg6[%c0_14, %c0_15] : memref<2x2xf32, #tpu.memory_space<vmem>>, vector<2x2xf32>
    tpu.vector_store %arg6[%c0_14, %c0_15], %30 {strides = array<i32>} : memref<2x2xf32, #tpu.memory_space<vmem>>, vector<2x2xf32>,
    return
  }
  func.func @transform_0(%arg0: i32) -> (i32, i32) {
    %c0_i32 = arith.constant 0 : i32
    %c0_i32_0 = arith.constant 0 : i32
    %c0_i32_1 = arith.constant 0 : i32
    return %c0_i32, %c0_i32_0 : i32, i32
  }
  func.func @transform_1(%arg0: i32) -> (i32, i32) {
    %c0_i32 = arith.constant 0 : i32
    %c0_i32_0 = arith.constant 0 : i32
    %c0_i32_1 = arith.constant 0 : i32
    return %c0_i32, %c0_i32_0 : i32, i32
  }
  func.func @transform_2(%arg0: i32) -> (i32, i32) {
    %c0_i32 = arith.constant 0 : i32
    %c0_i32_0 = arith.constant 0 : i32
    %c0_i32_1 = arith.constant 0 : i32
    return %c0_i32, %c0_i32_0 : i32, i32
  }
  func.func @transform_3(%arg0: i32) -> (i32, i32) {
    %c0_i32 = arith.constant 0 : i32
    %c0_i32_0 = arith.constant 0 : i32
    %c0_i32_1 = arith.constant 0 : i32
    return %c0_i32, %c0_i32_0 : i32, i32
  }
  func.func @transform_4(%arg0: i32) -> (i32, i32) {
    %c0_i32 = arith.constant 0 : i32
    %c0_i32_0 = arith.constant 0 : i32
    %c0_i32_1 = arith.constant 0 : i32
    return %c0_i32, %c0_i32_0 : i32, i32
  }
  func.func @transform_5(%arg0: i32) -> (i32, i32) {
    %c0_i32 = arith.constant 0 : i32
    %c0_i32_0 = arith.constant 0 : i32
    %c0_i32_1 = arith.constant 0 : i32
    return %c0_i32, %c0_i32_0 : i32, i32
  }
}

</mosaic_0001>

<bundles_post_ra>
// kernel: _lambda_.11
= control target key start
LH: loop header
LB: loop body
LE: loop exit
PB: predicated region body
PF: predicated region fallthrough
CT: control target
= control target key end

     0   :  { %s474_s15 = smov 0   ;;  %s476_s16 = smov 0   ;;  %s522_s0 = inlined_call_operand.vmem [shape: f32[2,8,3], index: 0, kind: input, shape index: {}]   ;;  %s523_s1 = inlined_call_operand.vmem [shape: f32[3,32], index: 1, kind: input, shape index: {}]   ;;  %s524_s2 = inlined_call_operand.vmem [shape: f32[1,32], index: 2, kind: input, shape index: {}]   ;;  %s525_s3 = inlined_call_operand.vmem [shape: f32[8,32], index: 3, kind: input, shape index: {}]   ;;  %s526_s4 = inlined_call_operand.vmem [shape: f32[2,8,32], index: 4, kind: output, shape index: {}]  }
   0x1   :  { %s478_s17 = smov 0  }
   0x2 LB: > { %s23_s18 = sadd.s32 1, %s440_s16  ;;  %p382_p0 = scmp.ge.s32.totalorder %s444_s17, 1  ;;  %s444_s17 = sphi %s478_s17, %s14_s17   ;;  %s440_s16 = sphi %s476_s16, %s528_s16   ;;  %s436_s15 = sphi %s474_s15, %s527_s15  }
   0x3   : > { %p24_p1 = scmp.ge.s32.totalorder %s23_s18, 2  ;;  %p189_p2 = scmp.lt.s32.totalorder %s444_s17, 3 }
   0x5   : > { %s530_s18 = smov (%p24_p1, %s23_s18), 0  ;;  %p190_p3 = pnand %p382_p0, %p189_p2 }
   0x6   : > { %p223_p4 = scmp.lt.s32.totalorder (!%p190_p3), %s436_s15, 1  ;;  %v446_v0 = vmov (!%p190_p3), 0   ;;  %v447_v1 = vmov (!%p190_p3), 2   ;;  %v448_v3 = vmov (!%p190_p3), 1   ;;  %v242_v4 = vld [vmem:[%s525_s3] sm:$0xff] (!%p190_p3)  ;;  %vm285_vm0 = vcmask (!%p190_p3), 261120  }
   0x7   : > { %193 = sbr.rel (%p190_p3) target bundleno = 158 (0x9e), region = 36  ;;  %418 = vset.pattern.permute.xlu0 (!%p190_p3), %v446_v0  ;;  %420 = vset.pattern.permute.xlu1 (!%p190_p3), %v447_v1  ;;  %v385_v5 = vld [vmem:[%s524_s2] ss:$0 sm:$0xff] (!%p190_p3)  ;;  %v387_v10 = vld [vmem:[%s523_s1 + $0x1] ss:$0 sm:$0xff] (!%p190_p3) }
   0x8   : > { %v386_v6 = vld [vmem:[%s523_s1] ss:$0 sm:$0xff] (!%p190_p3)  ;;  %v250_v8 = vadd.f32 (!%p190_p3), %v385_v5, %v242_v4  ;;  %v388_v11 = vld [vmem:[%s523_s1 + $0x2] ss:$0 sm:$0xff] (!%p190_p3) }
   0xe   : > { %s532_s15 = smov (!%p223_p4, %s436_s15), 1 }
   0xf   : > { %s383_s19 = sshll.u32 %s532_s15, 3 }
  0x10   : > { %s229_s22 = scalar_lea.vmem %s522_s0, %s383_s19  ;;  %s240_s9 = scalar_lea.vmem %s526_s4, %s383_s19 }
  0x11   : > { %v241_v2 = vld [vmem:[%s229_s22] sm:$0xff] }
  0x12   : > { %254 = vperm.xlu0 %418, %v241_v2   ;;  %276 = vperm.xlu1 %420, %v241_v2  }
  0x16   : > { %419 = vset.pattern.permute.xlu0 %v448_v3 }
  0x17   : > { %265 = vperm.xlu0 %419, %v241_v2  }
  0x1b   : > { %421 = vset.pattern.permute.xlu0 %v447_v1 }
  0x91   : > { %v255_v7 = vpop.permute.xlu0 %254  ;;  %v277_v12 = vpop.permute.xlu1 %276 }
  0x92   : > { %v261_v9 = vmul.f32 %v386_v6, %v255_v7  ;;  %v283_v16 = vmul.f32 %v388_v11, %v277_v12 }
  0x94   : > { %v262_v14 = vadd.f32 %v261_v9, %v250_v8 }
  0x96   : > { %v266_v13 = vpop.permute.xlu0 %265 }
  0x97   : > { %v272_v15 = vmul.f32 %v387_v10, %v266_v13 }
  0x99   : > { %v273_v17 = vadd.f32 %v272_v15, %v262_v14 }
  0x9b   : > { %v284_v18 = vadd.f32 %v283_v16, %v273_v17 }
  0x9d   : > { %286 = vst.msk [vmem:[%s240_s9] sm:$0xff] %vm285_vm0, %v284_v18 }
  0x9e PF: > { %s14_s17 = sadd.s32 1, %s444_s17   ;;  %s527_s15 = smov %s440_s16 }
  0x9f   : > { %p11_p5 = scmp.ge.s32.totalorder %s14_s17, 4   ;;  %s528_s16 = smov %s530_s18 }
  0xa1   :  { %13 = sbr.rel (!%p11_p5) target bundleno = 2 (0x2), region = 69 }

// kernel: _lambda_.13
= control target key start
LH: loop header
LB: loop body
LE: loop exit
PB: predicated region body
PF: predicated region fallthrough
CT: control target
= control target key end

     0   :  { %s760_s12 = smov 0   ;;  %s762_s13 = smov 0   ;;  %s834_s0 = inlined_call_operand.vmem [shape: bf16[4,16,8], index: 0, kind: input, shape index: {}]   ;;  %s835_s1 = inlined_call_operand.vmem [shape: bf16[4,16,8], index: 1, kind: input, shape index: {}]   ;;  %s836_s2 = inlined_call_operand.vmem [shape: bf16[4,16,8], index: 2, kind: input, shape index: {}]   ;;  %s837_s3 = inlined_call_operand.vmem [shape: bf16[4,16,8], index: 3, kind: output, shape index: {}]  }
   0x1   :  { %s764_s14 = smov 0   ;;  %s766_s15 = smov 0  }
   0x2   :  { %s768_s16 = smov 0  }
   0x3 LB: > { %s35_s17 = sadd.s32 1, %s726_s14  ;;  %s39_s18 = sadd.s32 1, %s730_s15  ;;  %s734_s16 = sphi %s768_s16, %s13_s16   ;;  %s730_s15 = sphi %s766_s15, %s841_s15   ;;  %s726_s14 = sphi %s764_s14, %s840_s14   ;;  %s722_s13 = sphi %s762_s13, %s839_s13   ;;  %s718_s12 = sphi %s760_s12, %s838_s12  }
   0x4   : > { %p37_p0 = scmp.ge.s32.totalorder %s35_s17, 2  ;;  %p615_p1 = scmp.ge.s32.totalorder %s734_s16, 1 }
   0x5   : > { %p214_p2 = scmp.lt.s32.totalorder %s734_s16, 9 }
   0x6   : > { %s843_s17 = smov (%p37_p0, %s35_s17), 0  ;;  %s845_s18 = smov (!%p37_p0, %s39_s18), %s730_s15 }
   0x7   : > { %p215_p3 = pnand %p615_p1, %p214_p2  ;;  %p41_p4 = scmp.ge.s32.totalorder %s845_s18, 4 }
   0x8   : > { %p265_p5 = scmp.lt.s32.totalorder (!%p215_p3), %s722_s13, 3  ;;  %p267_p6 = scmp.lt.s32.totalorder (!%p215_p3), %s718_s12, 1  ;;  %vm312_vm0 = vcmask (!%p215_p3), 64512   ;;  %v736_v0 = vmov (!%p215_p3), 0.0   ;;  %vm737_vm1 = vmmov (!%p215_p3), 0   ;;  %vm309_vm2 = vcmask (!%p215_p3), 7168  }
   0x9   : > { %s847_s18 = smov (%p41_p4, %s845_s18), 0  ;;  %218 = sbr.rel (%p215_p3) target bundleno = 830 (0x33e), region = 32 }
   0xa   : > { %632 = vmatprep.subr.bf16.mxu0 (!%p215_p3), %v736_v0  ;;  %313 = vst.msk [vmem:[#allocation4] sm:$0xff] (!%p215_p3), %vm312_vm0, %v736_v0  ;;  %634 = vmatprep.mubr.msk.bf16.mxu0 (!%p215_p3), %vm737_vm1, %v736_v0  ;;  %v738_v4 = vmov (!%p215_p3), -1e+30   ;;  %v372_v5 = vlaneseq (!%p215_p3)  ;;  %v739_v15 = vmov (!%p215_p3), 0   ;;  %vm417_vm4 = vcmask (!%p215_p3), 1043456  }
   0xb   : > { %638 = vmatprep.subr.bf16.mxu1 (!%p215_p3), %v736_v0  ;;  %640 = vmatprep.mubr.msk.bf16.mxu1 (!%p215_p3), %vm737_vm1, %v736_v0  ;;  %310 = vst.msk [vmem:[#allocation2] sm:$0xff] (!%p215_p3), %vm309_vm2, %v738_v4  ;;  %311 = vst.msk [vmem:[#allocation3] sm:$0xff] (!%p215_p3), %vm309_vm2, %v736_v0  ;;  %vm477_vm5 = vcmask (!%p215_p3), 60416  }
   0xc   : > { %v373_v6 = vshrl.u32 (!%p215_p3), %v372_v5, 7  ;;  %v377_v7 = vand.u32 (!%p215_p3), 127, %v372_v5  ;;  %688 = vset.pattern.permute.xlu0 (!%p215_p3), %v739_v15  ;;  %689 = vset.pattern.permute.xlu1 (!%p215_p3), %v739_v15 }
   0xe   : > { %vm380_vm3 = vcmp.le.s32.totalorder (!%p215_p3), %v377_v7, %v373_v6 }
  0x10   : > { %s849_s13 = smov (!%p265_p5, %s722_s13), 3  ;;  %s851_s12 = smov (!%p267_p6, %s718_s12), 1 }
  0x11   : > { %s616_s19 = sshll.u32 %s849_s13, 1  ;;  %v406_v36 = vld [vmem:[#allocation4] sm:$0xff] }
  0x12   : > { %s270_s20 = sadd.s32 %s616_s19, %s851_s12  ;;  %v382_v16 = vld [vmem:[#allocation2] sm:$0xff]  ;;  %v398_v30 = vld [vmem:[#allocation3] sm:$0xff] }
  0x13   : > { %s791_s21 = sshll.u32 %s270_s20, 2 }
  0x14   : > { %s282_s24 = scalar_lea.vmem %s835_s1, %s791_s21  ;;  %s272_s27 = scalar_lea.vmem %s834_s0, %s791_s21 }
  0x15   : > { %v322_v1 = vld [vmem:[%s282_s24] sm:$0xf]  ;;  %s292_s30 = scalar_lea.vmem %s836_s2, %s791_s21  ;;  %s302_s6 = scalar_lea.vmem %s837_s3, %s791_s21 }
  0x16   : > { %v329_v2 = vsel %vm312_vm0, %v322_v1, 0  ;;  %v321_v3 = vld [vmem:[%s272_s27] sm:$0xf] }
  0x17   : > { %633 = vmatpush3.bf16.xpose.msra.mxu0 %v329_v2  ;;  %v323_v20 = vld [vmem:[%s292_s30] sm:$0xf] }
  0x18   : > { %v419_v21 = vsel %vm417_vm4, %v323_v20, 0 }
  0x19   : > { %639 = vmatpush3.bf16.msra.mxu1 %v419_v21 }
  0x1e   : > { %635 = vmatmul.mubr.msk.bf16.vlgmr.msra.gmra.mrb[0].mxu0 %vm312_vm0, %v321_v3 }
  0xf1   : > { %v365_v8 = vpop.f32.mrb[0].mxu0 }
  0xf2   : > { %v371_v9 = vmul.f32 0.35355338, %v365_v8  ;;  %v636_v10 = vpop.f32.mrb[1].mxu0 }
  0xf3   : > { %v368_v11 = vpop.f32.mrb[2].mxu0 }
  0xf4   : > { %v637_v12 = vpop.f32.mrb[3].mxu0  ;;  %v381_v13 = vsel %vm380_vm3, %v371_v9, -1e+30 }
  0xf5   : > { %v383_v14 = vsel %vm312_vm0, %v381_v13, -inf }
  0xf6   : > { %384 = vmax.xlane.f32.xlu0 %v383_v14 }
 0x183   : > { %v385_v17 = vpop.xlane.xlu0 %384 }
 0x184   : > { %v386_v18 = vmax.f32 %v382_v16, %v385_v17 }
 0x186   : > { %v387_v19 = vsub.f32 %v382_v16, %v386_v18  ;;  %463 = vst.msk [vmem:[#allocation2] sm:$0xff] %vm309_vm2, %v386_v18  ;;  %392 = vperm.xlu0 %688, %v386_v18  }
 0x188   : > { %v388_v28 = vmul.f32 1.442695, %v387_v19 }
 0x205   : > { %v393_v22 = vpop.permute.xlu0 %392 }
 0x206   : > { %v395_v23 = vsub.f32 %v381_v13, %v393_v22 }
 0x208   : > { %v396_v24 = vmul.f32 1.442695, %v395_v23 }
 0x20a   : > { %690 = vpow2.f32 %v396_v24 }
 0x20b   : > { %692 = vpow2.f32 %v388_v28 }
 0x214   : > { %v691_v25 = vpop.eup %690 }
 0x215   : > { %v400_v26 = vsel %vm312_vm0, %v691_v25, 0.0  ;;  %v413_v27 = vpack.c.bf16 %v691_v25, %v691_v25  ;;  %v693_v29 = vpop.eup %692 }
 0x216   : > { %401 = vadd.xlane.f32.xlu1 %v400_v26  ;;  %v399_v31 = vmul.f32 %v693_v29, %v398_v30 }
 0x217   : > { %641 = vmatmul.mubr.msk.bf16.vlgmr.msra.gmra.mrb[0].mxu1 %vm312_vm0, %v413_v27 }
 0x227   : > { %409 = vperm.xlu1 %689, %v693_v29  }
 0x2a3   : > { %v402_v32 = vpop.xlane.xlu1 %401 }
 0x2a4   : > { %v403_v33 = vadd.f32 %v402_v32, %v399_v31 }
 0x2a6   : > { %405 = vst.msk [vmem:[#allocation3] sm:$0xff] %vm309_vm2, %v403_v33 }
 0x2a7   : > { %v410_v37 = vpop.permute.xlu1 %409 }
 0x2a8   : > { %v412_v38 = vmul.f32 %v410_v37, %v406_v36 }
 0x2ad   : > { %v467_v34 = vld [vmem:[#allocation3] sm:$0xff] }
 0x2ae   : > { %694 = vrcp.f32 %v467_v34 }
 0x2b8   : > { %v695_v35 = vpop.eup %694 }
 0x2b9   : > { %472 = vperm.xlu1 %689, %v695_v35  }
 0x2ea   : > { %v455_v39 = vpop.f32.mrb[0].mxu1 }
 0x2eb   : > { %v461_v40 = vadd.f32 %v455_v39, %v412_v38  ;;  %v642_v41 = vpop.f32.mrb[1].mxu1 }
 0x2ec   : > { %v458_v42 = vpop.f32.mrb[2].mxu1 }
 0x2ed   : > { %462 = vst.msk [vmem:[#allocation4] sm:$0xff] %vm312_vm0, %v461_v40  ;;  %v643_v43 = vpop.f32.mrb[3].mxu1 }
 0x2f4   : > { %v469_v44 = vld [vmem:[#allocation4] sm:$0xff] }
 0x338   : > { %v473_v45 = vpop.permute.xlu1 %472 }
 0x339   : > { %v475_v46 = vmul.f32 %v473_v45, %v469_v44 }
 0x33b   : > { %v476_v47 = vpack.c.bf16 %v475_v46, %v475_v46 }
 0x33d   : > { %478 = vst.msk [vmem:[%s302_s6] sm:$0xf] %vm477_vm5, %v476_v47 }
 0x33e PF: > { %s13_s16 = sadd.s32 1, %s734_s16   ;;  %s838_s12 = smov %s726_s14 }
 0x33f   : > { %p10_p7 = scmp.ge.s32.totalorder %s13_s16, 10   ;;  %s839_s13 = smov %s730_s15 }
 0x340   : > { %s840_s14 = smov %s843_s17  ;;  %s841_s15 = smov %s847_s18 }
 0x341   :  { %12 = sbr.rel (!%p10_p7) target bundleno = 3 (0x3), region = 80 }

// kernel: _lambda_.14
= control target key start
LH: loop header
LB: loop body
LE: loop exit
PB: predicated region body
PF: predicated region fallthrough
CT: control target
= control target key end

     0   :  { %vm53_vm0 = vcmask 1043456   ;;  %vm49_vm1 = vcmask 64512   ;;  %v656_v0 = vmov 0.0   ;;  %vm657_vm2 = vmmov 0   ;;  %s829_s2 = inlined_call_operand.vmem [shape: bf16[4,8,32], index: 2, kind: input, shape index: {}]   ;;  %s830_s1 = inlined_call_operand.vmem [shape: bf16[4,16,8], index: 1, kind: input, shape index: {}]   ;;  %s831_s0 = inlined_call_operand.vmem [shape: f32[16,32], index: 0, kind: input, shape index: {}]   ;;  %s832_s3 = inlined_call_operand.vmem [shape: f32[1,32], index: 3, kind: input, shape index: {}]   ;;  %s833_s6 = inlined_call_operand.vmem [shape: bf16[32,64], index: 6, kind: input, shape index: {}]   ;;  %s834_s4 = inlined_call_operand.vmem [shape: f32[1,32], index: 4, kind: input, shape index: {}]   ;;  %s835_s5 = inlined_call_operand.vmem [shape: f32[1,32], index: 5, kind: input, shape index: {}]   ;;  %s836_s8 = inlined_call_operand.vmem [shape: bf16[64,32], index: 8, kind: input, shape index: {}]   ;;  %s837_s7 = inlined_call_operand.vmem [shape: f32[1,64], index: 7, kind: input, shape index: {}]   ;;  %s838_s9 = inlined_call_operand.vmem [shape: f32[1,32], index: 9, kind: input, shape index: {}]   ;;  %s839_s10 = inlined_call_operand.vmem [shape: f32[16,32], index: 10, kind: output, shape index: {}]  }
   0x1   :  { %588 = vmatprep.subr.bf16.mxu0 %v656_v0  ;;  %594 = vmatprep.subr.bf16.mxu1 %v656_v0  ;;  %v544_v1 = vld [vmem:[%s829_s2 + $0x4] sm:$0xf]  ;;  %v38_v2 = vld [vmem:[%s829_s2] sm:$0xf]  ;;  %v634_v5 = vld [vmem:[%s830_s1 + $0x8] sm:$0xff]   ;;  %vm283_vm3 = vcmask 261120  }
   0x2   :  { %v55_v3 = vsel %vm53_vm0, %v544_v1, 0  ;;  %v107_v4 = vsel %vm53_vm0, %v38_v2, 0  ;;  %590 = vmatprep.mubr.msk.bf16.mxu0 %vm657_vm2, %v656_v0  ;;  %596 = vmatprep.mubr.msk.bf16.mxu1 %vm657_vm2, %v656_v0  ;;  %v635_v6 = vld [vmem:[%s830_s1] sm:$0xff]   ;;  %v551_v7 = vld [vmem:[%s829_s2 + $0x8] sm:$0xf]  ;;  %v636_v11 = vld [vmem:[%s830_s1 + $0x10] sm:$0xff]  }
   0x3   :  { %589 = vmatpush3.bf16.msra.mxu0 %v55_v3  ;;  %595 = vmatpush3.bf16.msra.mxu1 %v107_v4  ;;  %v164_v8 = vsel %vm53_vm0, %v551_v7, 0  ;;  %v556_v9 = vld [vmem:[%s829_s2 + $0xc] sm:$0xf]  ;;  %v637_v12 = vld [vmem:[%s830_s1 + $0x18] sm:$0xff]   ;;  %v268_v28 = vld [vmem:[%s831_s0] sm:$0xff]  ;;  %vm489_vm6 = vcmask 523264  }
   0x4   :  { %600 = vmatprep.subr.bf16.mxu0 %v656_v0  ;;  %606 = vmatprep.subr.bf16.mxu1 %v656_v0  ;;  %v223_v10 = vsel %vm53_vm0, %v556_v9, 0  ;;  %v269_v35 = vld [vmem:[%s831_s0 + $0x8] sm:$0xff]  ;;  %v559_v36 = vld [vmem:[%s832_s3] ss:$0 sm:$0xff] }
   0x5   :  { %v638_v54 = vld [vmem:[%s833_s6] sm:$0xff]   ;;  %v639_v55 = vld [vmem:[%s833_s6 + $0x8] sm:$0xff]  }
   0x6   :  { %591 = vmatmul.mubr.msk.bf16.vlgmr.msra.gmra.mrb[0].mxu0 %vm49_vm1, %v634_v5  ;;  %597 = vmatmul.mubr.msk.bf16.vlgmr.msra.gmra.mrb[0].mxu1 %vm49_vm1, %v635_v6  ;;  %v560_v1 = vld [vmem:[%s834_s4] ss:$0 sm:$0xff] }
   0x7   :  { %601 = vmatpush3.bf16.msra.mxu0 %v164_v8  ;;  %607 = vmatpush3.bf16.msra.mxu1 %v223_v10  ;;  %v561_v5 = vld [vmem:[%s835_s5] ss:$0 sm:$0xff] }
   0x8   :  { %602 = vmatprep.mubr.msk.bf16.mxu0 %vm657_vm2, %v656_v0  ;;  %608 = vmatprep.mubr.msk.bf16.mxu1 %vm657_vm2, %v656_v0  ;;  %v640_v10 = vld [vmem:[%s836_s8] sm:$0xff]  }
   0x9   :  { %612 = vmatprep.subr.bf16.mxu0 %v656_v0  ;;  %620 = vmatprep.subr.bf16.mxu1 %v656_v0 }
   0xe   :  { %603 = vmatmul.mubr.msk.bf16.vlgmr.msra.gmra.mrb[4].mxu0 %vm49_vm1, %v636_v11  ;;  %609 = vmatmul.mubr.msk.bf16.vlgmr.msra.gmra.mrb[4].mxu1 %vm49_vm1, %v637_v12  ;;  %v641_v11 = vld [vmem:[%s836_s8 + $0x8] sm:$0xff]   ;;  %v642_v12 = vld [vmem:[%s836_s8 + $0x10] sm:$0xff]  }
   0xf   :  { %616 = vmatprep.mubr.msk.bf16.mxu0 %vm657_vm2, %v656_v0  ;;  %628 = vmatprep.mubr.msk.bf16.mxu1 %vm657_vm2, %v656_v0 }
  0x10   :  { %613 = vmatpush3.bf16.msra.mxu0 %v638_v54  ;;  %621 = vmatpush3.bf16.msra.mxu1 %v640_v10  ;;  %v566_v10 = vld [vmem:[%s838_s9] ss:$0 sm:$0xff] }
  0x11   :  { %614 = vmatprep.subr.bf16.mxu0 %v656_v0  ;;  %622 = vmatprep.subr.bf16.mxu1 %v656_v0 }
  0x14   :  { %615 = vmatpush3.bf16.msra.mxu0 %v639_v55  ;;  %623 = vmatpush3.bf16.msra.mxu1 %v641_v11 }
  0x15   :  { %624 = vmatprep.subr.bf16.mxu1 %v656_v0 }
  0x18   :  { %625 = vmatpush3.bf16.msra.mxu1 %v642_v12 }
  0x19   :  { %626 = vmatprep.subr.bf16.mxu1 %v656_v0 }
  0xd9   :  { %v91_v13 = vpop.f32.mrb[0].mxu0  ;;  %v143_v14 = vpop.f32.mrb[0].mxu1 }
  0xda   :  { %v144_v15 = vadd.f32 %v143_v14, %v91_v13  ;;  %v592_v16 = vpop.f32.mrb[1].mxu0  ;;  %v598_v17 = vpop.f32.mrb[1].mxu1  ;;  %v643_v13 = vld [vmem:[%s836_s8 + $0x18] sm:$0xff]   ;;  %v562_v14 = vld [vmem:[%s837_s7] ss:$0 sm:$0xff] }
  0xdb   :  { %v94_v18 = vpop.f32.mrb[2].mxu0  ;;  %v146_v19 = vpop.f32.mrb[2].mxu1  ;;  %627 = vmatpush3.bf16.msra.mxu1 %v643_v13 }
  0xdc   :  { %v147_v20 = vadd.f32 %v146_v19, %v94_v18  ;;  %v593_v21 = vpop.f32.mrb[3].mxu0  ;;  %v599_v22 = vpop.f32.mrb[3].mxu1 }
  0xe1   :  { %v200_v23 = vpop.f32.mrb[4].mxu0  ;;  %v259_v24 = vpop.f32.mrb[4].mxu1 }
  0xe2   :  { %v207_v25 = vadd.f32 %v200_v23, %v144_v15  ;;  %v604_v26 = vpop.f32.mrb[5].mxu0  ;;  %v610_v27 = vpop.f32.mrb[5].mxu1 }
  0xe3   :  { %v203_v29 = vpop.f32.mrb[6].mxu0  ;;  %v262_v30 = vpop.f32.mrb[6].mxu1 }
  0xe4   :  { %v266_v31 = vadd.f32 %v259_v24, %v207_v25  ;;  %v208_v32 = vadd.f32 %v203_v29, %v147_v20  ;;  %v605_v33 = vpop.f32.mrb[7].mxu0  ;;  %v611_v34 = vpop.f32.mrb[7].mxu1 }
  0xe6   :  { %v270_v37 = vadd.f32 %v268_v28, %v266_v31  ;;  %v267_v38 = vadd.f32 %v262_v30, %v208_v32 }
  0xe8   :  { %v271_v39 = vadd.f32 %v269_v35, %v267_v38  ;;  %v772_v40 = vadd.f32 %v559_v36, %v270_v37 }
  0xea   :  { %v774_v41 = vadd.f32 %v559_v36, %v271_v39  ;;  %v284_v42 = vsel %vm283_vm3, %v772_v40, 0.0 }
  0xeb   :  { %285 = vadd.xlane.f32.xlu0 %v284_v42 }
  0xec   :  { %v287_v43 = vsel %vm283_vm3, %v774_v41, 0.0 }
  0xef   :  { %288 = vadd.xlane.f32.xlu0 %v287_v43 }
 0x178   :  { %v286_v44 = vpop.xlane.xlu0 %285 }
 0x179   :  { %v291_v45 = vmul.f32 0.03125, %v286_v44 }
 0x17b   :  { %v293_v46 = vsub.f32 %v772_v40, %v291_v45 }
 0x17c   :  { %v289_v47 = vpop.xlane.xlu0 %288 }
 0x17d   :  { %v292_v48 = vmul.f32 0.03125, %v289_v47  ;;  %v295_v49 = vmul.f32 %v293_v46, %v293_v46 }
 0x17f   :  { %v294_v50 = vsub.f32 %v774_v41, %v292_v48  ;;  %v297_v51 = vsel %vm283_vm3, %v295_v49, 0.0 }
 0x180   :  { %298 = vadd.xlane.f32.xlu1 %v297_v51 }
 0x181   :  { %v296_v52 = vmul.f32 %v294_v50, %v294_v50 }
 0x183   :  { %v300_v53 = vsel %vm283_vm3, %v296_v52, 0.0 }
 0x184   :  { %301 = vadd.xlane.f32.xlu1 %v300_v53 }
 0x20d   :  { %v299_v56 = vpop.xlane.xlu1 %298 }
 0x20e   :  { %v303_v57 = vmul.f32 0.03125, %v299_v56 }
 0x210   :  { %v305_v58 = vadd.f32 1e-05, %v303_v57 }
 0x211   :  { %v302_v59 = vpop.xlane.xlu1 %301 }
 0x212   :  { %644 = vrsqrt.f32 %v305_v58  ;;  %v304_v60 = vmul.f32 0.03125, %v302_v59 }
 0x214   :  { %v306_v61 = vadd.f32 1e-05, %v304_v60 }
 0x216   :  { %646 = vrsqrt.f32 %v306_v61 }
 0x21c   :  { %v645_v62 = vpop.eup %644 }
 0x21d   :  { %v309_v63 = vmul.f32 %v645_v62, %v293_v46 }
 0x21f   :  { %v317_v3 = vmul.f32 %v560_v1, %v309_v63 }
 0x220   :  { %v647_v2 = vpop.eup %646 }
 0x221   :  { %v310_v4 = vmul.f32 %v647_v2, %v294_v50  ;;  %v325_v7 = vadd.f32 %v561_v5, %v317_v3 }
 0x223   :  { %v318_v6 = vmul.f32 %v560_v1, %v310_v4 }
 0x225   :  { %v326_v8 = vadd.f32 %v561_v5, %v318_v6 }
 0x227   :  { %v327_v9 = vpack.c.bf16 %v326_v8, %v325_v7 }
 0x229   :  { %617 = vmatmul.mubr.msk.bf16.vlgmr.msra.gmra.mrb[8].mxu0 %vm283_vm3, %v327_v9 }
 0x2fc   :  { %v388_v15 = vpop.f32.mrb[8].mxu0 }
 0x2fd   :  { %v389_v16 = vadd.f32 %v562_v14, %v388_v15  ;;  %v618_v17 = vpop.f32.mrb[9].mxu0 }
 0x2fe   :  { %v391_v18 = vpop.f32.mrb[10].mxu0 }
 0x2ff   :  { %v397_v19 = vmul.f32 0.70710677, %v389_v16  ;;  %v392_v20 = vadd.f32 %v562_v14, %v391_v18  ;;  %v619_v21 = vpop.f32.mrb[11].mxu0  ;;  %v395_v4 = vmul.f32 0.5, %v389_v16 }
 0x301   :  { %v399_v22 = vand.u32 2147483647, %v397_v19  ;;  %v398_v23 = vmul.f32 0.70710677, %v392_v20  ;;  %vm439_vm4 = vcmp.ge.f32.partialorder %v397_v19, 0.0  ;;  %v396_v5 = vmul.f32 0.5, %v392_v20 }
 0x303   :  { %v401_v24 = vmul.f32 0.3275911, %v399_v22  ;;  %v400_v0 = vand.u32 2147483647, %v398_v23  ;;  %v427_v28 = vsub.f32 0.0, %v399_v22  ;;  %vm440_vm5 = vcmp.ge.f32.partialorder %v398_v23, 0.0 }
 0x305   :  { %v403_v25 = vadd.f32 1.0, %v401_v24  ;;  %v402_v26 = vmul.f32 0.3275911, %v400_v0  ;;  %v428_v29 = vsub.f32 0.0, %v400_v0  ;;  %v429_v31 = vmul.f32 %v427_v28, %v399_v22 }
 0x307   :  { %648 = vrcp.f32 %v403_v25  ;;  %v404_v27 = vadd.f32 1.0, %v402_v26  ;;  %v430_v35 = vmul.f32 %v428_v29, %v400_v0  ;;  %v431_v36 = vmul.f32 1.442695, %v429_v31 }
 0x309   :  { %650 = vrcp.f32 %v404_v27  ;;  %v433_v43 = vmul.f32 1.442695, %v430_v35 }
 0x30a   :  { %652 = vpow2.f32 %v431_v36 }
 0x30b   :  { %654 = vpow2.f32 %v433_v43 }
 0x311   :  { %v649_v30 = vpop.eup %648 }
 0x312   :  { %v409_v32 = vmul.f32 1.0614054, %v649_v30 }
 0x313   :  { %v651_v33 = vpop.eup %650 }
 0x314   :  { %v411_v34 = vadd.f32 -1.4531521, %v409_v32  ;;  %v410_v37 = vmul.f32 1.0614054, %v651_v33  ;;  %v653_v54 = vpop.eup %652 }
 0x315   :  { %v655_v58 = vpop.eup %654 }
 0x316   :  { %v413_v38 = vmul.f32 %v649_v30, %v411_v34  ;;  %v412_v39 = vadd.f32 -1.4531521, %v410_v37 }
 0x318   :  { %v415_v42 = vadd.f32 1.4214138, %v413_v38  ;;  %v414_v44 = vmul.f32 %v651_v33, %v412_v39 }
 0x31a   :  { %v417_v45 = vmul.f32 %v649_v30, %v415_v42  ;;  %v416_v46 = vadd.f32 1.4214138, %v414_v44 }
 0x31c   :  { %v419_v47 = vadd.f32 -0.28449672, %v417_v45  ;;  %v418_v48 = vmul.f32 %v651_v33, %v416_v46 }
 0x31e   :  { %v421_v49 = vmul.f32 %v649_v30, %v419_v47  ;;  %v420_v50 = vadd.f32 -0.28449672, %v418_v48 }
 0x320   :  { %v423_v51 = vadd.f32 0.2548296, %v421_v49  ;;  %v422_v52 = vmul.f32 %v651_v33, %v420_v50 }
 0x322   :  { %v425_v53 = vmul.f32 %v649_v30, %v423_v51  ;;  %v424_v55 = vadd.f32 0.2548296, %v422_v52 }
 0x324   :  { %v435_v56 = vmul.f32 %v653_v54, %v425_v53  ;;  %v426_v57 = vmul.f32 %v651_v33, %v424_v55 }
 0x326   :  { %v437_v59 = vsub.f32 1.0, %v435_v56  ;;  %v436_v60 = vmul.f32 %v655_v58, %v426_v57 }
 0x328   :  { %v441_v61 = vsub.f32 0.0, %v437_v59  ;;  %v438_v62 = vsub.f32 1.0, %v436_v60 }
 0x32a   :  { %v443_v63 = vsel %vm439_vm4, %v437_v59, %v441_v61  ;;  %v442_v1 = vsub.f32 0.0, %v438_v62 }
 0x32b   :  { %v445_v2 = vadd.f32 1.0, %v443_v63 }
 0x32c   :  { %v444_v3 = vsel %vm440_vm5, %v438_v62, %v442_v1 }
 0x32d   :  { %v446_v6 = vadd.f32 1.0, %v444_v3  ;;  %v447_v7 = vmul.f32 %v445_v2, %v395_v4 }
 0x32f   :  { %v448_v8 = vmul.f32 %v446_v6, %v396_v5 }
 0x331   :  { %v449_v9 = vpack.c.bf16 %v448_v8, %v447_v7 }
 0x333   :  { %629 = vmatmul.mubr.msk.bf16.vlgmr.msra.gmra.mrb[8].mxu1 %vm489_vm6, %v449_v9 }
 0x406   :  { %v527_v11 = vpop.f32.mrb[8].mxu1 }
 0x407   :  { %v528_v12 = vadd.f32 %v566_v10, %v527_v11  ;;  %v630_v13 = vpop.f32.mrb[9].mxu1 }
 0x408   :  { %v530_v14 = vpop.f32.mrb[10].mxu1 }
 0x409   :  { %v534_v15 = vadd.f32 %v528_v12, %v772_v40  ;;  %v531_v17 = vadd.f32 %v566_v10, %v530_v14  ;;  %v631_v18 = vpop.f32.mrb[11].mxu1 }
 0x40b   :  { %536 = vst.msk [vmem:[%s839_s10] sm:$0xff] %vm283_vm3, %v534_v15  ;;  %v535_v16 = vadd.f32 %v531_v17, %v774_v41 }
 0x40d   :  { %537 = vst.msk [vmem:[%s839_s10 + $0x8] sm:$0xff] %vm283_vm3, %v535_v16 }

// kernel: _lambda_.21
= control target key start
LH: loop header
LB: loop body
LE: loop exit
PB: predicated region body
PF: predicated region fallthrough
CT: control target
= control target key end

     0   :  { %vm25_vm0 = vcmask 254976   ;;  %s249_s0 = inlined_call_operand.vmem [shape: f32[2,32], index: 0, kind: input, shape index: {}]   ;;  %s250_s1 = inlined_call_operand.vmem [shape: f32[1,32], index: 1, kind: input, shape index: {}]   ;;  %s251_s2 = inlined_call_operand.vmem [shape: f32[1,32], index: 2, kind: input, shape index: {}]   ;;  %s252_s3 = inlined_call_operand.vmem [shape: bf16[32,2], index: 3, kind: input, shape index: {}]   ;;  %s253_s4 = inlined_call_operand.vmem [shape: f32[1,2], index: 4, kind: input, shape index: {}]   ;;  %s254_s5 = inlined_call_operand.hbm [shape: f32[2,2], index: 5, kind: output, shape index: {}]  }
   0x1   :  { %v22_v0 = vld [vmem:[%s249_s0] sm:$0x3] }
   0x2   :  { %v26_v1 = vsel %vm25_vm0, %v22_v0, 0.0 }
   0x3   :  { %27 = vadd.xlane.f32.xlu0 %v26_v1 }
   0x4   :  { %10 = vsyncpa [#allocation3], 0  ;;  %v158_v7 = vld [vmem:[%s252_s3] sm:$0xff]   ;;  %v186_v8 = vmov 0.0   ;;  %v159_v9 = vld [vmem:[%s252_s3 + $0x8] sm:$0xff]   ;;  %vm187_vm1 = vmmov 0  }
   0x5   :  { %147 = vmatprep.subr.bf16.mxu0 %v186_v8  ;;  %151 = vmatprep.mubr.msk.bf16.mxu0 %vm187_vm1, %v186_v8  ;;  %v138_v14 = vld [vmem:[%s250_s1] ss:$0 sm:$0xff]  ;;  %vm78_vm2 = vcmask 261120   ;;  %s188_s28 = smov [#allocation2]   ;;  %vm122_vm3 = vcmask 9216  }
   0x6   :  { %148 = vmatpush3.bf16.msra.mxu0 %v158_v7  ;;  %v139_v16 = vld [vmem:[%s251_s2] ss:$0 sm:$0xff]  ;;  %s130_s29 = sshll.u32 %s188_s28, 4  ;;  %s131_s29 = int_to_ptr.vmem [resolvable:$true] %s130_s29 }
   0x7   :  { %149 = vmatprep.subr.bf16.mxu0 %v186_v8  ;;  %v140_v20 = vld [vmem:[%s253_s4] ss:$0 sm:$0xff]  ;;  %s162_s1 = scalar_lea.vmem %s131_s29, 32  ;;  %p167_p1 = scmp.lt.s32.totalorder %s131_s29, %s131_s29 }
   0x8   :  { %p163_p0 = scmp.ne.s32.totalorder %s131_s29, %s162_s1  ;;  %p168_p2 = scmp.lt.s32.totalorder %s162_s1, %s162_s1 }
   0xa   :  { %150 = vmatpush3.bf16.msra.mxu0 %v159_v9  ;;  %p169_p3 = por %p168_p2, %p167_p1 }
   0xc   :  { %p170_p4 = pnand %p169_p3, %p163_p0 }
  0x90   :  { %v28_v2 = vpop.xlane.xlu0 %27 }
  0x91   :  { %v30_v3 = vmul.f32 0.03125, %v28_v2 }
  0x93   :  { %v31_v4 = vsub.f32 %v22_v0, %v30_v3 }
  0x95   :  { %v32_v5 = vmul.f32 %v31_v4, %v31_v4 }
  0x97   :  { %v33_v6 = vsel %vm25_vm0, %v32_v5, 0.0 }
  0x98   :  { %34 = vadd.xlane.f32.xlu0 %v33_v6 }
 0x125   :  { %v35_v10 = vpop.xlane.xlu0 %34 }
 0x126   :  { %v36_v11 = vmul.f32 0.03125, %v35_v10 }
 0x128   :  { %v37_v12 = vadd.f32 1e-05, %v36_v11 }
 0x12a   :  { %160 = vrsqrt.f32 %v37_v12 }
 0x134   :  { %v161_v13 = vpop.eup %160 }
 0x135   :  { %v39_v15 = vmul.f32 %v161_v13, %v31_v4 }
 0x137   :  { %v46_v17 = vmul.f32 %v138_v14, %v39_v15 }
 0x139   :  { %v53_v18 = vadd.f32 %v139_v16, %v46_v17 }
 0x13b   :  { %v54_v19 = vpack.c.bf16 %v53_v18, %v53_v18 }
 0x13d   :  { %152 = vmatmul.mubr.msk.bf16.vlgmr.msra.gmra.mrb[0].mxu0 %vm78_vm2, %v54_v19 }
 0x210   :  { %v116_v21 = vpop.f32.mrb[0].mxu0 }
 0x211   :  { %v117_v22 = vadd.f32 %v140_v20, %v116_v21  ;;  %v153_v23 = vpop.f32.mrb[1].mxu0 }
 0x212   :  { %v119_v24 = vpop.f32.mrb[2].mxu0 }
 0x213   :  { %v154_v25 = vpop.f32.mrb[3].mxu0  ;;  %123 = vst.msk [vmem:[#allocation2] sm:$0x3] %vm122_vm3, %v117_v22 }
 0x214   :  { %173 = shalt.err (!%p170_p4)
}
 0x215   :  { %s174_s4 = scalar_lea.hbm %s254_s5, 32 }
 0x216   :  { %p175_p5 = scmp.ne.s32.totalorder %s254_s5, %s174_s4  ;;  %p178_p6 = scmp.lt.u32.totalorder %s174_s4, %s254_s5 }
 0x218   :  { %p180_p7 = pnand %p178_p6, %p175_p5 }
 0x21a   :  { %183 = shalt.err (!%p180_p7)
}
 0x21b   :  { %133 = dma.vmem_to_hbm [thread:$0]  %s131_s29, 32, %s254_s5, [#allocation3]  }
 0x21c   :  { %184 = dma.done.wait [#allocation3], 32  }
 0x21d   :  { %185 = vsyncadd [#allocation3], 4294967264 }
 0x21e   :  { %137 = vsyncpa [#allocation3], 1 }

// kernel: _lambda_.12
= control target key start
LH: loop header
LB: loop body
LE: loop exit
PB: predicated region body
PF: predicated region fallthrough
CT: control target
= control target key end

     0   :  { %vm40_vm0 = vcmask 261120   ;;  %v1339_v15 = vmov 0.0   ;;  %vm1340_vm1 = vmmov 0   ;;  %vm288_vm2 = vcmask 60416   ;;  %s1695_s0 = inlined_call_operand.vmem [shape: f32[16,32], index: 0, kind: input, shape index: {}]   ;;  %s1696_s3 = inlined_call_operand.vmem [shape: bf16[4,32,8], index: 3, kind: input, shape index: {}]   ;;  %s1697_s4 = inlined_call_operand.vmem [shape: bf16[4,32,8], index: 4, kind: input, shape index: {}]   ;;  %s1698_s5 = inlined_call_operand.vmem [shape: bf16[4,32,8], index: 5, kind: input, shape index: {}]   ;;  %s1699_s1 = inlined_call_operand.vmem [shape: f32[1,32], index: 1, kind: input, shape index: {}]   ;;  %s1700_s2 = inlined_call_operand.vmem [shape: f32[1,32], index: 2, kind: input, shape index: {}]   ;;  %s1701_s6 = inlined_call_operand.vmem [shape: f32[4,1,8], index: 6, kind: input, shape index: {}]   ;;  %s1702_s7 = inlined_call_operand.vmem [shape: f32[4,1,8], index: 7, kind: input, shape index: {}]   ;;  %s1703_s9 = inlined_call_operand.vmem [shape: bf16[4,16,8], index: 9, kind: output, shape index: {0}]   ;;  %s1704_s10 = inlined_call_operand.vmem [shape: bf16[4,16,8], index: 10, kind: output, shape index: {1}]   ;;  %s1705_s8 = inlined_call_operand.vmem [shape: f32[4,1,8], index: 8, kind: input, shape index: {}]   ;;  %s1706_s11 = inlined_call_operand.vmem [shape: bf16[4,16,8], index: 11, kind: output, shape index: {2}]  }
   0x1   :  { %v36_v0 = vld [vmem:[%s1695_s0] sm:$0xff]  ;;  %v37_v1 = vld [vmem:[%s1695_s0 + $0x8] sm:$0xff]  ;;  %1213 = vmatprep.subr.bf16.mxu0 %v1339_v15  ;;  %1221 = vmatprep.subr.bf16.mxu1 %v1339_v15  ;;  %v1316_v36 = vld [vmem:[%s1696_s3 + $0x10] sm:$0xff]  }
   0x2   :  { %v41_v2 = vsel %vm40_vm0, %v36_v0, 0.0  ;;  %v44_v3 = vsel %vm40_vm0, %v37_v1, 0.0  ;;  %v1311_v14 = vld [vmem:[%s1696_s3] sm:$0xff]   ;;  %v1313_v17 = vld [vmem:[%s1696_s3 + $0x8] sm:$0xff]   ;;  %1217 = vmatprep.mubr.msk.bf16.mxu0 %vm1340_vm1, %v1339_v15  ;;  %1225 = vmatprep.mubr.msk.bf16.mxu1 %vm1340_vm1, %v1339_v15  ;;  %v1318_v39 = vld [vmem:[%s1696_s3 + $0x18] sm:$0xff]  }
   0x3   :  { %42 = vadd.xlane.f32.xlu0 %v41_v2  ;;  %v1312_v16 = vld [vmem:[%s1697_s4] sm:$0xff]   ;;  %1214 = vmatpush3.bf16.msra.mxu0 %v1311_v14  ;;  %v1314_v18 = vld [vmem:[%s1697_s4 + $0x8] sm:$0xff]   ;;  %v1319_v40 = vld [vmem:[%s1697_s4 + $0x10] sm:$0xff]  }
   0x4   :  { %1222 = vmatpush3.bf16.msra.mxu1 %v1312_v16  ;;  %1215 = vmatprep.subr.bf16.mxu0 %v1339_v15  ;;  %v1016_v27 = vld [vmem:[%s1699_s1] ss:$0 sm:$0xff]  ;;  %v1317_v38 = vld [vmem:[%s1698_s5 + $0x8] sm:$0xff]   ;;  %v1320_v41 = vld [vmem:[%s1698_s5 + $0x10] sm:$0xff]  }
   0x5   :  { %1223 = vmatprep.subr.bf16.mxu1 %v1339_v15  ;;  %v1017_v31 = vld [vmem:[%s1700_s2] ss:$0 sm:$0xff]  ;;  %v1321_v42 = vld [vmem:[%s1697_s4 + $0x18] sm:$0xff]   ;;  %v1325_v46 = vld [vmem:[%s1696_s3 + $0x28] sm:$0xff]  }
   0x6   :  { %v1315_v35 = vld [vmem:[%s1698_s5] sm:$0xff]   ;;  %v1322_v43 = vld [vmem:[%s1698_s5 + $0x18] sm:$0xff]   ;;  %v1326_v47 = vld [vmem:[%s1697_s4 + $0x28] sm:$0xff]  }
   0x7   :  { %45 = vadd.xlane.f32.xlu0 %v44_v3  ;;  %1216 = vmatpush3.bf16.msra.mxu0 %v1313_v17  ;;  %v1323_v44 = vld [vmem:[%s1696_s3 + $0x20] sm:$0xff]   ;;  %v1328_v49 = vld [vmem:[%s1696_s3 + $0x30] sm:$0xff]   ;;  %v1329_v50 = vld [vmem:[%s1698_s5 + $0x28] sm:$0xff]  }
   0x8   :  { %1224 = vmatpush3.bf16.msra.mxu1 %v1314_v18  ;;  %1229 = vmatprep.subr.bf16.mxu0 %v1339_v15  ;;  %v1324_v45 = vld [vmem:[%s1697_s4 + $0x20] sm:$0xff]   ;;  %v1330_v51 = vld [vmem:[%s1696_s3 + $0x38] sm:$0xff]   ;;  %v1331_v52 = vld [vmem:[%s1697_s4 + $0x30] sm:$0xff]  }
   0x9   :  { %1237 = vmatprep.subr.bf16.mxu1 %v1339_v15  ;;  %v1327_v48 = vld [vmem:[%s1698_s5 + $0x20] sm:$0xff]   ;;  %v1332_v53 = vld [vmem:[%s1698_s5 + $0x30] sm:$0xff]   ;;  %v1333_v54 = vld [vmem:[%s1697_s4 + $0x38] sm:$0xff]  }
   0xa   :  { %v1334_v55 = vld [vmem:[%s1698_s5 + $0x38] sm:$0xff]   ;;  %v1018_v56 = vld [vmem:[%s1701_s6] ss:$0 sm:$0xff] }
   0xb   :  { %v1022_v57 = vld [vmem:[%s1702_s7] ss:$0 sm:$0xff] }
  0x90   :  { %v43_v4 = vpop.xlane.xlu0 %42 }
  0x91   :  { %v48_v5 = vmul.f32 0.03125, %v43_v4 }
  0x93   :  { %v50_v6 = vsub.f32 %v36_v0, %v48_v5 }
  0x94   :  { %v46_v7 = vpop.xlane.xlu0 %45 }
  0x95   :  { %v49_v8 = vmul.f32 0.03125, %v46_v7  ;;  %v52_v9 = vmul.f32 %v50_v6, %v50_v6 }
  0x97   :  { %v51_v10 = vsub.f32 %v37_v1, %v49_v8  ;;  %v54_v11 = vsel %vm40_vm0, %v52_v9, 0.0 }
  0x98   :  { %55 = vadd.xlane.f32.xlu1 %v54_v11  ;;  %v1041_v11 = vld [vmem:[%s1701_s6 + $0x1] ss:$0 sm:$0xff] }
  0x99   :  { %v53_v12 = vmul.f32 %v51_v10, %v51_v10 }
  0x9b   :  { %v57_v13 = vsel %vm40_vm0, %v53_v12, 0.0 }
  0x9c   :  { %58 = vadd.xlane.f32.xlu1 %v57_v13 }
 0x125   :  { %v56_v19 = vpop.xlane.xlu1 %55 }
 0x126   :  { %v60_v20 = vmul.f32 0.03125, %v56_v19 }
 0x128   :  { %v62_v21 = vadd.f32 1e-05, %v60_v20 }
 0x129   :  { %v59_v22 = vpop.xlane.xlu1 %58 }
 0x12a   :  { %1335 = vrsqrt.f32 %v62_v21  ;;  %v61_v23 = vmul.f32 0.03125, %v59_v22 }
 0x12c   :  { %v63_v24 = vadd.f32 1e-05, %v61_v23 }
 0x12e   :  { %1337 = vrsqrt.f32 %v63_v24 }
 0x134   :  { %v1336_v25 = vpop.eup %1335 }
 0x135   :  { %v66_v26 = vmul.f32 %v1336_v25, %v50_v6 }
 0x137   :  { %v74_v29 = vmul.f32 %v1016_v27, %v66_v26 }
 0x138   :  { %v1338_v28 = vpop.eup %1337 }
 0x139   :  { %v67_v30 = vmul.f32 %v1338_v28, %v51_v10  ;;  %v82_v33 = vadd.f32 %v1017_v31, %v74_v29  ;;  %v1026_v10 = vld [vmem:[%s1705_s8] ss:$0 sm:$0xff]  ;;  %v1050_v28 = vld [vmem:[%s1702_s7 + $0x1] ss:$0 sm:$0xff] }
 0x13a   :  { %v1059_v29 = vld [vmem:[%s1705_s8 + $0x1] ss:$0 sm:$0xff] }
 0x13b   :  { %v75_v32 = vmul.f32 %v1016_v27, %v67_v30 }
 0x13d   :  { %v83_v34 = vadd.f32 %v1017_v31, %v75_v32 }
 0x13f   :  { %v1445_v37 = vpack.c.bf16 %v83_v34, %v82_v33 }
 0x141   :  { %1218 = vmatmul.mubr.msk.bf16.vlgmr.msra.gmra.mrb[0].mxu0 %vm40_vm0, %v1445_v37  ;;  %1226 = vmatmul.mubr.msk.bf16.vlgmr.msra.gmra.mrb[0].mxu1 %vm40_vm0, %v1445_v37 }
 0x142   :  { %1230 = vmatpush3.bf16.msra.mxu0 %v1315_v35  ;;  %1238 = vmatpush3.bf16.msra.mxu1 %v1316_v36 }
 0x143   :  { %1231 = vmatprep.subr.bf16.mxu0 %v1339_v15  ;;  %1239 = vmatprep.subr.bf16.mxu1 %v1339_v15 }
 0x144   :  { %1233 = vmatprep.mubr.msk.bf16.mxu0 %vm1340_vm1, %v1339_v15  ;;  %1241 = vmatprep.mubr.msk.bf16.mxu1 %vm1340_vm1, %v1339_v15 }
 0x146   :  { %1232 = vmatpush3.bf16.msra.mxu0 %v1317_v38  ;;  %1240 = vmatpush3.bf16.msra.mxu1 %v1318_v39 }
 0x147   :  { %1245 = vmatprep.subr.bf16.mxu0 %v1339_v15  ;;  %1253 = vmatprep.subr.bf16.mxu1 %v1339_v15 }
 0x149   :  { %1234 = vmatmul.mubr.msk.bf16.vlgmr.msra.gmra.mrb[4].mxu0 %vm40_vm0, %v1445_v37  ;;  %1242 = vmatmul.mubr.msk.bf16.vlgmr.msra.gmra.mrb[4].mxu1 %vm40_vm0, %v1445_v37 }
 0x14a   :  { %1246 = vmatpush3.bf16.msra.mxu0 %v1319_v40  ;;  %1254 = vmatpush3.bf16.msra.mxu1 %v1320_v41 }
 0x14b   :  { %1247 = vmatprep.subr.bf16.mxu0 %v1339_v15  ;;  %1255 = vmatprep.subr.bf16.mxu1 %v1339_v15 }
 0x14c   :  { %1249 = vmatprep.mubr.msk.bf16.mxu0 %vm1340_vm1, %v1339_v15  ;;  %1257 = vmatprep.mubr.msk.bf16.mxu1 %vm1340_vm1, %v1339_v15 }
 0x14e   :  { %1248 = vmatpush3.bf16.msra.mxu0 %v1321_v42  ;;  %1256 = vmatpush3.bf16.msra.mxu1 %v1322_v43 }
 0x14f   :  { %1261 = vmatprep.subr.bf16.mxu0 %v1339_v15  ;;  %1269 = vmatprep.subr.bf16.mxu1 %v1339_v15 }
 0x151   :  { %1250 = vmatmul.mubr.msk.bf16.vlgmr.msra.gmra.mrb[8].mxu0 %vm40_vm0, %v1445_v37  ;;  %1258 = vmatmul.mubr.msk.bf16.vlgmr.msra.gmra.mrb[8].mxu1 %vm40_vm0, %v1445_v37 }
 0x152   :  { %1262 = vmatpush3.bf16.msra.mxu0 %v1323_v44  ;;  %1270 = vmatpush3.bf16.msra.mxu1 %v1324_v45 }
 0x153   :  { %1263 = vmatprep.subr.bf16.mxu0 %v1339_v15  ;;  %1271 = vmatprep.subr.bf16.mxu1 %v1339_v15 }
 0x154   :  { %1265 = vmatprep.mubr.msk.bf16.mxu0 %vm1340_vm1, %v1339_v15  ;;  %1273 = vmatprep.mubr.msk.bf16.mxu1 %vm1340_vm1, %v1339_v15 }
 0x156   :  { %1264 = vmatpush3.bf16.msra.mxu0 %v1325_v46  ;;  %1272 = vmatpush3.bf16.msra.mxu1 %v1326_v47  ;;  %v1080_v46 = vld [vmem:[%s1701_s6 + $0x2] ss:$0 sm:$0xff] }
 0x157   :  { %1277 = vmatprep.subr.bf16.mxu0 %v1339_v15  ;;  %1285 = vmatprep.subr.bf16.mxu1 %v1339_v15  ;;  %v1089_v47 = vld [vmem:[%s1702_s7 + $0x2] ss:$0 sm:$0xff] }
 0x159   :  { %1266 = vmatmul.mubr.msk.bf16.vlgmr.msra.gmra.mrb[12].mxu0 %vm40_vm0, %v1445_v37  ;;  %1274 = vmatmul.mubr.msk.bf16.vlgmr.msra.gmra.mrb[12].mxu1 %vm40_vm0, %v1445_v37 }
 0x15a   :  { %1278 = vmatpush3.bf16.msra.mxu0 %v1327_v48  ;;  %1286 = vmatpush3.bf16.msra.mxu1 %v1328_v49 }
 0x15b   :  { %1279 = vmatprep.subr.bf16.mxu0 %v1339_v15  ;;  %1287 = vmatprep.subr.bf16.mxu1 %v1339_v15 }
 0x15c   :  { %1281 = vmatprep.mubr.msk.bf16.mxu0 %vm1340_vm1, %v1339_v15  ;;  %1289 = vmatprep.mubr.msk.bf16.mxu1 %vm1340_vm1, %v1339_v15 }
 0x15e   :  { %1280 = vmatpush3.bf16.msra.mxu0 %v1329_v50  ;;  %1288 = vmatpush3.bf16.msra.mxu1 %v1330_v51 }
 0x15f   :  { %1293 = vmatprep.subr.bf16.mxu0 %v1339_v15  ;;  %1301 = vmatprep.subr.bf16.mxu1 %v1339_v15 }
 0x161   :  { %1282 = vmatmul.mubr.msk.bf16.vlgmr.msra.gmra.mrb[16].mxu0 %vm40_vm0, %v1445_v37  ;;  %1290 = vmatmul.mubr.msk.bf16.vlgmr.msra.gmra.mrb[16].mxu1 %vm40_vm0, %v1445_v37 }
 0x162   :  { %1294 = vmatpush3.bf16.msra.mxu0 %v1331_v52  ;;  %1302 = vmatpush3.bf16.msra.mxu1 %v1332_v53 }
 0x163   :  { %1295 = vmatprep.subr.bf16.mxu0 %v1339_v15  ;;  %1303 = vmatprep.subr.bf16.mxu1 %v1339_v15 }
 0x164   :  { %1297 = vmatprep.mubr.msk.bf16.mxu0 %vm1340_vm1, %v1339_v15  ;;  %1305 = vmatprep.mubr.msk.bf16.mxu1 %vm1340_vm1, %v1339_v15 }
 0x166   :  { %1296 = vmatpush3.bf16.msra.mxu0 %v1333_v54  ;;  %1304 = vmatpush3.bf16.msra.mxu1 %v1334_v55 }
 0x169   :  { %1298 = vmatmul.mubr.msk.bf16.vlgmr.msra.gmra.mrb[20].mxu0 %vm40_vm0, %v1445_v37  ;;  %1306 = vmatmul.mubr.msk.bf16.vlgmr.msra.gmra.mrb[20].mxu1 %vm40_vm0, %v1445_v37 }
 0x214   :  { %v145_v58 = vpop.f32.mrb[0].mxu0  ;;  %v209_v59 = vpop.f32.mrb[0].mxu1 }
 0x215   :  { %v146_v60 = vadd.f32 %v1018_v56, %v145_v58  ;;  %v210_v61 = vadd.f32 %v1022_v57, %v209_v59  ;;  %v1219_v62 = vpop.f32.mrb[1].mxu0  ;;  %v1227_v63 = vpop.f32.mrb[1].mxu1 }
 0x216   :  { %v148_v0 = vpop.f32.mrb[2].mxu0  ;;  %v212_v1 = vpop.f32.mrb[2].mxu1 }
 0x217   :  { %v1153_v2 = vpack.c.bf16 %v146_v60, %v146_v60  ;;  %v1155_v3 = vpack.c.bf16 %v210_v61, %v210_v61  ;;  %v149_v4 = vadd.f32 %v1018_v56, %v148_v0  ;;  %v213_v5 = vadd.f32 %v1022_v57, %v212_v1  ;;  %v1220_v6 = vpop.f32.mrb[3].mxu0  ;;  %v1228_v7 = vpop.f32.mrb[3].mxu1  ;;  %v1098_v0 = vld [vmem:[%s1705_s8 + $0x2] ss:$0 sm:$0xff]  ;;  %v1119_v1 = vld [vmem:[%s1701_s6 + $0x3] ss:$0 sm:$0xff] }
 0x219   :  { %289 = vst.msk [vmem:[%s1703_s9] sm:$0xf] %vm288_vm2, %v1153_v2  ;;  %299 = vst.msk [vmem:[%s1704_s10] sm:$0xf] %vm288_vm2, %v1155_v3  ;;  %v1154_v8 = vpack.c.bf16 %v149_v4, %v149_v4  ;;  %v1156_v9 = vpack.c.bf16 %v213_v5, %v213_v5 }
 0x21b   :  { %290 = vst.msk [vmem:[%s1703_s9 + $0x4] sm:$0xf] %vm288_vm2, %v1154_v8  ;;  %300 = vst.msk [vmem:[%s1704_s10 + $0x4] sm:$0xf] %vm288_vm2, %v1156_v9 }
 0x21c   :  { %v273_v12 = vpop.f32.mrb[4].mxu0  ;;  %v370_v13 = vpop.f32.mrb[4].mxu1 }
 0x21d   :  { %v274_v14 = vadd.f32 %v1026_v10, %v273_v12  ;;  %v371_v15 = vadd.f32 %v1041_v11, %v370_v13  ;;  %v1235_v16 = vpop.f32.mrb[5].mxu0  ;;  %v1243_v17 = vpop.f32.mrb[5].mxu1 }
 0x21e   :  { %v276_v18 = vpop.f32.mrb[6].mxu0  ;;  %v373_v19 = vpop.f32.mrb[6].mxu1 }
 0x21f   :  { %v1157_v20 = vpack.c.bf16 %v274_v14, %v274_v14  ;;  %v1159_v21 = vpack.c.bf16 %v371_v15, %v371_v15  ;;  %v277_v22 = vadd.f32 %v1026_v10, %v276_v18  ;;  %v374_v23 = vadd.f32 %v1041_v11, %v373_v19  ;;  %v1236_v24 = vpop.f32.mrb[7].mxu0  ;;  %v1244_v25 = vpop.f32.mrb[7].mxu1  ;;  %v1128_v18 = vld [vmem:[%s1702_s7 + $0x3] ss:$0 sm:$0xff] }
 0x220   :  { %v1137_v19 = vld [vmem:[%s1705_s8 + $0x3] ss:$0 sm:$0xff] }
 0x221   :  { %309 = vst.msk [vmem:[%s1706_s11] sm:$0xf] %vm288_vm2, %v1157_v20  ;;  %1065 = vst.msk [vmem:[%s1703_s9 + $0x8] sm:$0xf] %vm288_vm2, %v1159_v21  ;;  %v1158_v26 = vpack.c.bf16 %v277_v22, %v277_v22  ;;  %v1160_v27 = vpack.c.bf16 %v374_v23, %v374_v23 }
 0x223   :  { %310 = vst.msk [vmem:[%s1706_s11 + $0x4] sm:$0xf] %vm288_vm2, %v1158_v26  ;;  %1066 = vst.msk [vmem:[%s1703_s9 + $0xc] sm:$0xf] %vm288_vm2, %v1160_v27 }
 0x224   :  { %v436_v30 = vpop.f32.mrb[8].mxu0  ;;  %v502_v31 = vpop.f32.mrb[8].mxu1 }
 0x225   :  { %v437_v32 = vadd.f32 %v1050_v28, %v436_v30  ;;  %v503_v33 = vadd.f32 %v1059_v29, %v502_v31  ;;  %v1251_v34 = vpop.f32.mrb[9].mxu0  ;;  %v1259_v35 = vpop.f32.mrb[9].mxu1 }
 0x226   :  { %v439_v36 = vpop.f32.mrb[10].mxu0  ;;  %v505_v37 = vpop.f32.mrb[10].mxu1 }
 0x227   :  { %v1161_v38 = vpack.c.bf16 %v437_v32, %v437_v32  ;;  %v1163_v39 = vpack.c.bf16 %v503_v33, %v503_v33  ;;  %v440_v40 = vadd.f32 %v1050_v28, %v439_v36  ;;  %v506_v41 = vadd.f32 %v1059_v29, %v505_v37  ;;  %v1252_v42 = vpop.f32.mrb[11].mxu0  ;;  %v1260_v43 = vpop.f32.mrb[11].mxu1 }
 0x229   :  { %1069 = vst.msk [vmem:[%s1704_s10 + $0x8] sm:$0xf] %vm288_vm2, %v1161_v38  ;;  %1073 = vst.msk [vmem:[%s1706_s11 + $0x8] sm:$0xf] %vm288_vm2, %v1163_v39  ;;  %v1162_v44 = vpack.c.bf16 %v440_v40, %v440_v40  ;;  %v1164_v45 = vpack.c.bf16 %v506_v41, %v506_v41 }
 0x22b   :  { %1070 = vst.msk [vmem:[%s1704_s10 + $0xc] sm:$0xf] %vm288_vm2, %v1162_v44  ;;  %1074 = vst.msk [vmem:[%s1706_s11 + $0xc] sm:$0xf] %vm288_vm2, %v1164_v45 }
 0x22c   :  { %v601_v48 = vpop.f32.mrb[12].mxu0  ;;  %v667_v49 = vpop.f32.mrb[12].mxu1 }
 0x22d   :  { %v602_v50 = vadd.f32 %v1080_v46, %v601_v48  ;;  %v668_v51 = vadd.f32 %v1089_v47, %v667_v49  ;;  %v1267_v52 = vpop.f32.mrb[13].mxu0  ;;  %v1275_v53 = vpop.f32.mrb[13].mxu1 }
 0x22e   :  { %v604_v54 = vpop.f32.mrb[14].mxu0  ;;  %v670_v55 = vpop.f32.mrb[14].mxu1 }
 0x22f   :  { %v1165_v56 = vpack.c.bf16 %v602_v50, %v602_v50  ;;  %v1167_v57 = vpack.c.bf16 %v668_v51, %v668_v51  ;;  %v605_v58 = vadd.f32 %v1080_v46, %v604_v54  ;;  %v671_v59 = vadd.f32 %v1089_v47, %v670_v55  ;;  %v1268_v60 = vpop.f32.mrb[15].mxu0  ;;  %v1276_v61 = vpop.f32.mrb[15].mxu1 }
 0x231   :  { %1104 = vst.msk [vmem:[%s1703_s9 + $0x10] sm:$0xf] %vm288_vm2, %v1165_v56  ;;  %1108 = vst.msk [vmem:[%s1704_s10 + $0x10] sm:$0xf] %vm288_vm2, %v1167_v57  ;;  %v1166_v62 = vpack.c.bf16 %v605_v58, %v605_v58  ;;  %v1168_v63 = vpack.c.bf16 %v671_v59, %v671_v59 }
 0x233   :  { %1105 = vst.msk [vmem:[%s1703_s9 + $0x14] sm:$0xf] %vm288_vm2, %v1166_v62  ;;  %1109 = vst.msk [vmem:[%s1704_s10 + $0x14] sm:$0xf] %vm288_vm2, %v1168_v63 }
 0x234   :  { %v733_v2 = vpop.f32.mrb[16].mxu0  ;;  %v832_v3 = vpop.f32.mrb[16].mxu1 }
 0x235   :  { %v734_v4 = vadd.f32 %v1098_v0, %v733_v2  ;;  %v833_v5 = vadd.f32 %v1119_v1, %v832_v3  ;;  %v1283_v6 = vpop.f32.mrb[17].mxu0  ;;  %v1291_v7 = vpop.f32.mrb[17].mxu1 }
 0x236   :  { %v736_v8 = vpop.f32.mrb[18].mxu0  ;;  %v835_v9 = vpop.f32.mrb[18].mxu1 }
 0x237   :  { %v1169_v10 = vpack.c.bf16 %v734_v4, %v734_v4  ;;  %v1171_v11 = vpack.c.bf16 %v833_v5, %v833_v5  ;;  %v737_v12 = vadd.f32 %v1098_v0, %v736_v8  ;;  %v836_v13 = vadd.f32 %v1119_v1, %v835_v9  ;;  %v1284_v14 = vpop.f32.mrb[19].mxu0  ;;  %v1292_v15 = vpop.f32.mrb[19].mxu1 }
 0x239   :  { %1112 = vst.msk [vmem:[%s1706_s11 + $0x10] sm:$0xf] %vm288_vm2, %v1169_v10  ;;  %1143 = vst.msk [vmem:[%s1703_s9 + $0x18] sm:$0xf] %vm288_vm2, %v1171_v11  ;;  %v1170_v16 = vpack.c.bf16 %v737_v12, %v737_v12  ;;  %v1172_v17 = vpack.c.bf16 %v836_v13, %v836_v13 }
 0x23b   :  { %1113 = vst.msk [vmem:[%s1706_s11 + $0x14] sm:$0xf] %vm288_vm2, %v1170_v16  ;;  %1144 = vst.msk [vmem:[%s1703_s9 + $0x1c] sm:$0xf] %vm288_vm2, %v1172_v17 }
 0x23c   :  { %v898_v20 = vpop.f32.mrb[20].mxu0  ;;  %v964_v21 = vpop.f32.mrb[20].mxu1 }
 0x23d   :  { %v899_v22 = vadd.f32 %v1128_v18, %v898_v20  ;;  %v965_v23 = vadd.f32 %v1137_v19, %v964_v21  ;;  %v1299_v24 = vpop.f32.mrb[21].mxu0  ;;  %v1307_v25 = vpop.f32.mrb[21].mxu1 }
 0x23e   :  { %v901_v26 = vpop.f32.mrb[22].mxu0  ;;  %v967_v27 = vpop.f32.mrb[22].mxu1 }
 0x23f   :  { %v1173_v28 = vpack.c.bf16 %v899_v22, %v899_v22  ;;  %v1175_v29 = vpack.c.bf16 %v965_v23, %v965_v23  ;;  %v902_v30 = vadd.f32 %v1128_v18, %v901_v26  ;;  %v968_v31 = vadd.f32 %v1137_v19, %v967_v27  ;;  %v1300_v32 = vpop.f32.mrb[23].mxu0  ;;  %v1308_v33 = vpop.f32.mrb[23].mxu1 }
 0x241   :  { %1147 = vst.msk [vmem:[%s1704_s10 + $0x18] sm:$0xf] %vm288_vm2, %v1173_v28  ;;  %1151 = vst.msk [vmem:[%s1706_s11 + $0x18] sm:$0xf] %vm288_vm2, %v1175_v29  ;;  %v1174_v34 = vpack.c.bf16 %v902_v30, %v902_v30  ;;  %v1176_v35 = vpack.c.bf16 %v968_v31, %v968_v31 }
 0x243   :  { %1148 = vst.msk [vmem:[%s1704_s10 + $0x1c] sm:$0xf] %vm288_vm2, %v1174_v34  ;;  %1152 = vst.msk [vmem:[%s1706_s11 + $0x1c] sm:$0xf] %vm288_vm2, %v1176_v35 }

</bundles_post_ra>
